<compile_context>
chip_gen: v7x
topology: tpu7x:2x2x1
jax: 0.10.0
libtpu: 0.0.40
codegen_flags: <defaults>
</compile_context>

<pallas_src>
import jax
import jax.numpy as jnp
from jax.experimental import pallas as pl
from jax.experimental.pallas import tpu as pltpu

LRELU_SLOPE = 0.1
KSIZE = 3
DILATIONS = (1, 3)

# Rows of input context each side needed by the two stacked "same" dilated
# convs: (K//2) * (d1 + d2) = 4.
CTX = (KSIZE // 2) * sum(DILATIONS)
# 8-row-aligned halo actually loaded.  Must be a multiple of 8 (sublane-aligned
# blocks + free epilogue slice) and >= CTX so that roll wrap-around corruption
# (which stays within CTX rows of the window edges) never reaches the center.
HALO = 8
assert HALO % 8 == 0 and HALO >= CTX


def _resblock2_kernel(len_ref, xl_ref, xc_ref, xr_ref, w_ref, b_ref, o_ref):
    # len_ref: (B,) int32 SMEM (scalar prefetch) -- valid frames per batch
    # xl_ref:  (1, HALO,   Cp) f32  left-halo rows  [j*TT - HALO, j*TT)
    # xc_ref:  (1, TILE_T, Cp) f32  center rows     [j*TT, (j+1)*TT)
    # xr_ref:  (1, HALO,   Cp) f32  right-halo rows [(j+1)*TT, (j+1)*TT + HALO)
    # w_ref:   (2, KSIZE*Cp, Cp) bf16  fused-tap weights (VMEM-resident)
    # b_ref:   (2, 1, Cp) f32  biases
    # o_ref:   (1, TILE_T, Cp) f32
    b = pl.program_id(0)
    j = pl.program_id(1)
    TT = o_ref.shape[1]
    length = len_ref[b]

    # Assemble the extended window (E = TT + 2*HALO rows).  VMEM-only sublane
    # concat of three 8-aligned pieces; no HBM traffic, no gather.
    x = jnp.concatenate([xl_ref[0], xc_ref[0], xr_ref[0]], axis=0)    # (E, Cp)
    E = x.shape[0]

    # Prefix mask rebuilt from the valid length.  Window row i is global frame
    # t = j*TT - HALO + i.  Halo rows with t outside [0, length) -- including
    # the clamped / duplicated blocks at the sequence edges -- are zeroed,
    # which is exactly the conv's zero padding.
    row = jax.lax.broadcasted_iota(jnp.int32, (E, 1), 0)
    t = j * TT - HALO + row
    mask = jnp.logical_and(t >= 0, t < length).astype(jnp.float32)    # (E, 1)

    for li, dil in enumerate(DILATIONS):
        # Pre-activation + mask in f32 on the VPU (v5e has no bf16 VPU).
        xt = jnp.where(x > 0.0, x, LRELU_SLOPE * x) * mask            # (E, Cp)

        # Dilated conv: three rolled copies (XLU) fused into one 3*Cp-deep MXU
        # matmul.  Each tap is cast to bf16 right after the roll so the lane
        # concat and the matmul LHS are bf16 (no (E, 3*Cp) f32 temporary).
        # Roll wrap-around only corrupts rows within CTX(=4) of the window
        # edges, strictly inside the HALO(=8) rows that are never emitted.
        taps = []
        for k in range(KSIZE):
            s = (-(k - 1) * dil) % E
            tap = pltpu.roll(xt, s, axis=0) if s else xt
            taps.append(tap.astype(jnp.bfloat16))
        lhs = jnp.concatenate(taps, axis=1)                            # (E, 3*Cp) bf16
        y = jnp.dot(lhs, w_ref[li], preferred_element_type=jnp.float32)
        x = y + b_ref[li] + x                                          # bias + residual (f32)

    # Center rows: 8-aligned static slices (free), no roll / relayout.
    o_ref[0] = (x[HALO:HALO + TT] * mask[HALO:HALO + TT]).astype(o_ref.dtype)


def _vmem_capacity_bytes():
    try:
        return int(pltpu.get_tpu_info().vmem_capacity_bytes)
    except Exception:
        return 64 * 1024 * 1024      # conservative (v7x-sized) fallback


def _pick_tiling(T, Cp, tile_t=None):
    """Per-generation time tile and scoped-VMEM limit.

    v5e / v6e (128 MiB VMEM): ~28 MiB activation budget, tiles up to 2048,
    96 MiB scoped limit.  v7x (64 MiB per TensorCore): ~10 MiB budget, tiles
    up to 1024, 40 MiB limit (headroom for compiler-internal scratch)."""
    vmem = _vmem_capacity_bytes()
    if vmem >= 96 * 1024 * 1024:
        act_budget, max_tile, vmem_limit = 28 << 20, 2048, 96 << 20
    else:
        act_budget, max_tile, vmem_limit = 10 << 20, 1024, 40 << 20
    if tile_t is None:
        # in(x2 buf) + window + bf16 taps/lhs + f32 acc + out(x2 buf) ~ 40 B/row/lane
        tile_t = act_budget // (Cp * 40)
        tile_t = int(max(8, min(max_tile, (tile_t // 8) * 8)))
        tile_t = min(tile_t, -(-T // 8) * 8)
    assert tile_t % 8 == 0 and tile_t >= 8
    return tile_t, vmem_limit


def resblock2_forward(x_nct, x_mask_n1t, w1, b1, w2, b2, tile_t=None):
    """ResBlock2 forward.
    x_nct: (B, C, T) float; x_mask_n1t: (B, 1, T) prefix (length) mask or None;
    w*: (C, C, KSIZE) (weight_norm already folded); b*: (C,).  Returns (B, C, T) f32."""
    B, C, T = x_nct.shape
    assert w1.shape == (C, C, KSIZE) and w2.shape == (C, C, KSIZE)
    Cp = -(-C // 128) * 128                      # lane-pad channels to 128
    # TODO(synk): for the C in {32, 64} HiFiGAN stages, keep the HBM-side last
    # dim = C and pad only the fused contraction / output lanes to avoid moving
    # and multiplying 2-4x zeros.

    if x_mask_n1t is None:
        lengths = jnp.full((B,), T, jnp.int32)
    else:
        m = x_mask_n1t[:, 0, :] > 0
        lengths = jnp.sum(m, axis=-1).astype(jnp.int32)
        # Kernel rebuilds the mask from per-batch lengths; validate (when the
        # mask is concrete) that it really is a prefix/length mask.
        try:
            prefix = jnp.arange(T)[None, :] < lengths[:, None]
            if not bool(jnp.all(m == prefix)):
                raise ValueError(
                    "resblock2_forward: x_mask must be a prefix (length) mask")
        except jax.errors.ConcretizationTypeError:
            pass                                 # traced mask: skip the check

    TILE_T, vmem_limit = _pick_tiling(T, Cp, tile_t)
    nt = -(-T // TILE_T)
    Tp = nt * TILE_T

    # Layout glue (XLA, outside the kernel): NCT -> BTC + pad.  No overlapping
    # window copy is materialized; halos come from two extra BlockSpecs below.
    # TODO(synk): keep activations in (B, T, C) across the surrounding vocoder
    # so this transpose (and the one on the way out) disappears.
    x_btc = jnp.transpose(x_nct, (0, 2, 1)).astype(jnp.float32)
    if Tp != T or Cp != C:
        x_btc = jnp.pad(x_btc, ((0, 0), (0, Tp - T), (0, Cp - C)))

    def prep_w(w):                               # (Cout, Cin, K) -> (K*Cp, Cp)
        wk = jnp.transpose(w, (2, 1, 0))         # (K, Cin, Cout)
        wk = jnp.pad(wk, ((0, 0), (0, Cp - C), (0, Cp - C)))
        return wk.reshape(KSIZE * Cp, Cp)        # fused-tap layout

    w_all = jnp.stack([prep_w(w1), prep_w(w2)], 0).astype(jnp.bfloat16)
    b_all = jnp.stack(
        [jnp.pad(b1, (0, Cp - C)), jnp.pad(b2, (0, Cp - C))], 0
    ).reshape(2, 1, Cp).astype(jnp.float32)

    n_tblk = Tp // 8                             # 8-row block count of x_btc
    ht = TILE_T // 8                             # tile size in 8-row blocks

    cost = pl.CostEstimate(
        flops=2 * len(DILATIONS) * B * Tp * (KSIZE * Cp) * Cp,
        transcendentals=0,
        bytes_accessed=(2 * B * Tp * Cp + 2 * B * nt * HALO * Cp) * 4
        + w_all.size * 2 + b_all.size * 4,
    )

    def build_call(single_buffer_consts):
        const_kw = dict(pipeline_mode=pl.Buffered(1)) if single_buffer_consts else {}
        in_specs = [
            # Left halo: 8 rows ending at the tile start (clamped at the first
            # block; duplicated rows are masked in-kernel -> zero padding).
            pl.BlockSpec((1, HALO, Cp),
                         lambda b, j, lens: (b, jnp.maximum(j * ht - 1, 0), 0)),
            # Center tile.
            pl.BlockSpec((1, TILE_T, Cp), lambda b, j, lens: (b, j, 0)),
            # Right halo: 8 rows after the tile end (clamped at the last block).
            pl.BlockSpec((1, HALO, Cp),
                         lambda b, j, lens: (b, jnp.minimum((j + 1) * ht, n_tblk - 1), 0)),
            # Weights / biases: constant index map -> VMEM-resident.
            pl.BlockSpec((2, KSIZE * Cp, Cp), lambda b, j, lens: (0, 0, 0), **const_kw),
            pl.BlockSpec((2, 1, Cp), lambda b, j, lens: (0, 0, 0), **const_kw),
        ]
        return pl.pallas_call(
            _resblock2_kernel,
            # Kernel I/O kept f32 to match the PyTorch module; switch to bf16
            # (plus bf16 out_shape) if the surrounding vocoder tolerates it.
            out_shape=jax.ShapeDtypeStruct((B, Tp, Cp), jnp.float32),
            grid_spec=pltpu.PrefetchScalarGridSpec(
                num_scalar_prefetch=1,
                grid=(B, nt),
                in_specs=in_specs,
                out_specs=pl.BlockSpec((1, TILE_T, Cp), lambda b, j, lens: (b, j, 0)),
            ),
            compiler_params=pltpu.CompilerParams(
                dimension_semantics=("parallel", "parallel"),
                vmem_limit_bytes=vmem_limit,
            ),
            cost_estimate=cost,
        )

    args = (lengths, x_btc, x_btc, x_btc, w_all, b_all)
    try:
        # Single-buffer the constant-index weight/bias blocks (saves the
        # redundant second VMEM buffer; matters for v7x's 64 MiB budget).
        out = build_call(True)(*args)
    except Exception:
        # pipeline_mode=pl.Buffered(1) not accepted by this jax version.
        out = build_call(False)(*args)

    return jnp.transpose(out[:, :T, :C], (0, 2, 1))            # back to NCT


def _ref_forward(x, mask, w1, b1, w2, b2):
    """Pure-JAX f32 reference (NCT layout) mirroring the PyTorch forward."""
    for w, b, d in ((w1, b1, DILATIONS[0]), (w2, b2, DILATIONS[1])):
        xt = jnp.where(x > 0, x, LRELU_SLOPE * x) * mask
        y = jax.lax.conv_general_dilated(
            xt, w, window_strides=(1,), padding=[(d, d)],
            rhs_dilation=(d,), dimension_numbers=("NCH", "OIH", "NCH"))
        y = y + b[None, :, None]
        x = y + x
    return x * mask


def _weight_norm_init(key, c_out, c_in, k):
    """Deterministic synthetic weight_norm(Conv1d) params: weight = g * v / ||v||."""
    kv, kb = jax.random.split(key)
    v = 0.01 * jax.random.normal(kv, (c_out, c_in, k), jnp.float32)
    g = jnp.sqrt(jnp.sum(v * v, axis=(1, 2), keepdims=True))   # init: g = ||v||
    w = g * v / jnp.sqrt(jnp.sum(v * v, axis=(1, 2), keepdims=True))
    b = 0.01 * jax.random.normal(kb, (c_out,), jnp.float32)
    return w, b


if __name__ == "__main__":
    B, C, T = 2, 4, 16
    key = jax.random.PRNGKey(0)
    kx, k1, k2 = jax.random.split(key, 3)

    x = jax.random.normal(kx, (B, C, T), jnp.float32)           # NCT, like PyTorch
    lengths = jnp.array([16, 12])                               # second example shorter
    x_mask = (jnp.arange(T)[None, None, :] < lengths[:, None, None]).astype(jnp.float32)

    w1, b1 = _weight_norm_init(k1, C, C, KSIZE)
    w2, b2 = _weight_norm_init(k2, C, C, KSIZE)

    ref = _ref_forward(x, x_mask, w1, b1, w2, b2)

    # tile_t=8 forces two time tiles so the halo BlockSpecs and the clamped
    # edge blocks are exercised; the second run uses the auto per-generation tile.
    for tt in (8, None):
        out = resblock2_forward(x, x_mask, w1, b1, w2, b2, tile_t=tt)
        out = jax.block_until_ready(out)
        assert out.shape == (B, C, T)
        max_err = float(jnp.max(jnp.abs(out - ref)))
        # bf16 MXU operands with f32 accumulation -> looser tolerance than pure f32.
        assert jnp.allclose(out, ref, atol=2e-3, rtol=2e-3), \
            f"tile_t={tt}: mismatch vs reference (max abs err {max_err})"

    # x_mask=None path.
    out_nm = jax.block_until_ready(resblock2_forward(x, None, w1, b1, w2, b2, tile_t=8))
    ref_nm = _ref_forward(x, jnp.ones((B, 1, T), jnp.float32), w1, b1, w2, b2)
    assert jnp.allclose(out_nm, ref_nm, atol=2e-3, rtol=2e-3), "mask=None path mismatch"

    print("KERNEL_OK")
</pallas_src>

<mosaic_0001>
module attributes {stable_mosaic.version = 11 : i64} {
  func.func @_resblock2_kernel(%arg0: i32, %arg1: i32, %arg2: memref<2xi32, #tpu.memory_space<smem>>, %arg3: memref<1x8x128xf32, #tpu.memory_space<vmem>>, %arg4: memref<1x8x128xf32, #tpu.memory_space<vmem>>, %arg5: memref<1x8x128xf32, #tpu.memory_space<vmem>>, %arg6: memref<2x384x128xbf16, #tpu.memory_space<vmem>>, %arg7: memref<2x1x128xf32, #tpu.memory_space<vmem>>, %arg8: memref<1x8x128xf32, #tpu.memory_space<vmem>>) attributes {dimension_semantics = [#tpu.dimension_semantics<parallel>, #tpu.dimension_semantics<parallel>], iteration_bounds = array<i64: 2, 2>, scalar_prefetch = 1 : i64, scratch_operands = 0 : i64, tpu.core_type = #tpu.core_type<tc>, window_params = [{transform_indices = @transform_0, window_bounds = array<i64: 1, 8, 128>}, {transform_indices = @transform_1, window_bounds = array<i64: 1, 8, 128>}, {transform_indices = @transform_2, window_bounds = array<i64: 1, 8, 128>}, {pipeline_mode = #tpu.pipeline_mode<synchronous>, transform_indices = @transform_3, window_bounds = array<i64: 2, 384, 128>}, {pipeline_mode = #tpu.pipeline_mode<synchronous>, transform_indices = @transform_4, window_bounds = array<i64: 2, 1, 128>}, {transform_indices = @transform_5, window_bounds = array<i64: 1, 8, 128>}]} {
    %0 = arith.index_cast %arg0 : i32 to index
    %1 = memref.load %arg2[%0] : memref<2xi32, #tpu.memory_space<smem>>
    %c0 = arith.constant 0 : index
    %c0_0 = arith.constant 0 : index
    %c0_1 = arith.constant 0 : index
    %2 = vector.load %arg3[%c0, %c0_0, %c0_1] : memref<1x8x128xf32, #tpu.memory_space<vmem>>, vector<1x8x128xf32>
    %3 = vector.shape_cast %2 : vector<1x8x128xf32> to vector<8x128xf32>
    %c0_2 = arith.constant 0 : index
    %c0_3 = arith.constant 0 : index
    %c0_4 = arith.constant 0 : index
    %4 = vector.load %arg4[%c0_2, %c0_3, %c0_4] : memref<1x8x128xf32, #tpu.memory_space<vmem>>, vector<1x8x128xf32>
    %5 = vector.shape_cast %4 : vector<1x8x128xf32> to vector<8x128xf32>
    %c0_5 = arith.constant 0 : index
    %c0_6 = arith.constant 0 : index
    %c0_7 = arith.constant 0 : index
    %6 = vector.load %arg5[%c0_5, %c0_6, %c0_7] : memref<1x8x128xf32, #tpu.memory_space<vmem>>, vector<1x8x128xf32>
    %7 = vector.shape_cast %6 : vector<1x8x128xf32> to vector<8x128xf32>
    %8 = tpu.concatenate %3, %5, %7 in 0 : vector<8x128xf32>, vector<8x128xf32>, vector<8x128xf32> -> vector<24x128xf32>
    %9 = tpu.iota {dimensions = array<i32: 0>} : vector<24x1xi32>
    %c8_i32 = arith.constant 8 : i32
    %10 = arith.muli %arg1, %c8_i32 : i32
    %c8_i32_8 = arith.constant 8 : i32
    %11 = arith.subi %10, %c8_i32_8 : i32
    %12 = vector.broadcast %11 : i32 to vector<24x1xi32>
    %13 = arith.addi %12, %9 : vector<24x1xi32>
    %c0_i32 = arith.constant 0 : i32
    %14 = vector.broadcast %c0_i32 : i32 to vector<24x1xi32>
    %15 = arith.cmpi sge, %13, %14 : vector<24x1xi32>
    %16 = vector.broadcast %1 : i32 to vector<24x1xi32>
    %17 = arith.cmpi slt, %13, %16 : vector<24x1xi32>
    %18 = arith.andi %15, %17 : vector<24x1xi1>
    %19 = arith.extui %18 : vector<24x1xi1> to vector<24x1xi32>
    %20 = arith.sitofp %19 : vector<24x1xi32> to vector<24x1xf32>
    %cst = arith.constant 0.000000e+00 : f32
    %21 = vector.broadcast %cst : f32 to vector<24x128xf32>
    %22 = arith.cmpf ogt, %8, %21 : vector<24x128xf32>
    %cst_9 = arith.constant 1.000000e-01 : f32
    %23 = vector.broadcast %cst_9 : f32 to vector<24x128xf32>
    %24 = arith.mulf %23, %8 : vector<24x128xf32>
    %25 = arith.select %22, %8, %24 : vector<24x128xi1>, vector<24x128xf32>
    %26 = vector.broadcast %20 : vector<24x1xf32> to vector<24x128xf32>
    %27 = arith.mulf %25, %26 : vector<24x128xf32>
    %c1_i32 = arith.constant 1 : i32
    %28 = tpu.dynamic_rotate %27 by %c1_i32 dim 0 : vector<24x128xf32>, i32 -> vector<24x128xf32>
    %29 = arith.truncf %28 : vector<24x128xf32> to vector<24x128xbf16>
    %30 = arith.truncf %27 : vector<24x128xf32> to vector<24x128xbf16>
    %c23_i32 = arith.constant 23 : i32
    %31 = tpu.dynamic_rotate %27 by %c23_i32 dim 0 : vector<24x128xf32>, i32 -> vector<24x128xf32>
    %32 = arith.truncf %31 : vector<24x128xf32> to vector<24x128xbf16>
    %33 = tpu.concatenate %29, %30, %32 in 1 : vector<24x128xbf16>, vector<24x128xbf16>, vector<24x128xbf16> -> vector<24x384xbf16>
    %c0_10 = arith.constant 0 : index
    %c0_11 = arith.constant 0 : index
    %c0_12 = arith.constant 0 : index
    %34 = vector.load %arg6[%c0_10, %c0_11, %c0_12] : memref<2x384x128xbf16, #tpu.memory_space<vmem>>, vector<1x384x128xbf16>
    %35 = vector.shape_cast %34 : vector<1x384x128xbf16> to vector<384x128xbf16>
    %cst_13 = arith.constant dense<0.000000e+00> : vector<24x128xf32>
    %36 = tpu.matmul %33, %35, %cst_13 {dimension_numbers = #tpu.dot_dimension_numbers<[1], [0], [0], [1], [0, 0, 1, 1], [], []>} : vector<24x384xbf16>, vector<384x128xbf16>, vector<24x128xf32> -> vector<24x128xf32>
    %c0_14 = arith.constant 0 : index
    %c0_15 = arith.constant 0 : index
    %c0_16 = arith.constant 0 : index
    %37 = vector.load %arg7[%c0_14, %c0_15, %c0_16] : memref<2x1x128xf32, #tpu.memory_space<vmem>>, vector<1x1x128xf32>
    %38 = vector.shape_cast %37 : vector<1x1x128xf32> to vector<1x128xf32>
    %39 = vector.broadcast %38 : vector<1x128xf32> to vector<24x128xf32>
    %40 = arith.addf %36, %39 : vector<24x128xf32>
    %41 = arith.addf %40, %8 : vector<24x128xf32>
    %cst_17 = arith.constant 0.000000e+00 : f32
    %42 = vector.broadcast %cst_17 : f32 to vector<24x128xf32>
    %43 = arith.cmpf ogt, %41, %42 : vector<24x128xf32>
    %cst_18 = arith.constant 1.000000e-01 : f32
    %44 = vector.broadcast %cst_18 : f32 to vector<24x128xf32>
    %45 = arith.mulf %44, %41 : vector<24x128xf32>
    %46 = arith.select %43, %41, %45 : vector<24x128xi1>, vector<24x128xf32>
    %47 = vector.broadcast %20 : vector<24x1xf32> to vector<24x128xf32>
    %48 = arith.mulf %46, %47 : vector<24x128xf32>
    %c3_i32 = arith.constant 3 : i32
    %49 = tpu.dynamic_rotate %48 by %c3_i32 dim 0 : vector<24x128xf32>, i32 -> vector<24x128xf32>
    %50 = arith.truncf %49 : vector<24x128xf32> to vector<24x128xbf16>
    %51 = arith.truncf %48 : vector<24x128xf32> to vector<24x128xbf16>
    %c21_i32 = arith.constant 21 : i32
    %52 = tpu.dynamic_rotate %48 by %c21_i32 dim 0 : vector<24x128xf32>, i32 -> vector<24x128xf32>
    %53 = arith.truncf %52 : vector<24x128xf32> to vector<24x128xbf16>
    %54 = tpu.concatenate %50, %51, %53 in 1 : vector<24x128xbf16>, vector<24x128xbf16>, vector<24x128xbf16> -> vector<24x384xbf16>
    %c1 = arith.constant 1 : index
    %c0_19 = arith.constant 0 : index
    %c0_20 = arith.constant 0 : index
    %55 = vector.load %arg6[%c1, %c0_19, %c0_20] : memref<2x384x128xbf16, #tpu.memory_space<vmem>>, vector<1x384x128xbf16>
    %56 = vector.shape_cast %55 : vector<1x384x128xbf16> to vector<384x128xbf16>
    %cst_21 = arith.constant dense<0.000000e+00> : vector<24x128xf32>
    %57 = tpu.matmul %54, %56, %cst_21 {dimension_numbers = #tpu.dot_dimension_numbers<[1], [0], [0], [1], [0, 0, 1, 1], [], []>} : vector<24x384xbf16>, vector<384x128xbf16>, vector<24x128xf32> -> vector<24x128xf32>
    %c1_22 = arith.constant 1 : index
    %c0_23 = arith.constant 0 : index
    %c0_24 = arith.constant 0 : index
    %58 = vector.load %arg7[%c1_22, %c0_23, %c0_24] : memref<2x1x128xf32, #tpu.memory_space<vmem>>, vector<1x1x128xf32>
    %59 = vector.shape_cast %58 : vector<1x1x128xf32> to vector<1x128xf32>
    %60 = vector.broadcast %59 : vector<1x128xf32> to vector<24x128xf32>
    %61 = arith.addf %57, %60 : vector<24x128xf32>
    %62 = arith.addf %61, %41 : vector<24x128xf32>
    %63 = vector.extract_strided_slice %62 {offsets = [8, 0], sizes = [8, 128], strides = [1, 1]} : vector<24x128xf32> to vector<8x128xf32>
    %64 = vector.extract_strided_slice %20 {offsets = [8, 0], sizes = [8, 1], strides = [1, 1]} : vector<24x1xf32> to vector<8x1xf32>
    %65 = vector.broadcast %64 : vector<8x1xf32> to vector<8x128xf32>
    %66 = arith.mulf %63, %65 : vector<8x128xf32>
    %c0_25 = arith.constant 0 : index
    %c0_26 = arith.constant 0 : index
    %c0_27 = arith.constant 0 : index
    %67 = vector.load %arg8[%c0_25, %c0_26, %c0_27] : memref<1x8x128xf32, #tpu.memory_space<vmem>>, vector<1x8x128xf32>
    %68 = vector.shape_cast %67 : vector<1x8x128xf32> to vector<8x128xf32>
    %69 = vector.shape_cast %66 : vector<8x128xf32> to vector<1x8x128xf32>
    tpu.vector_store %arg8[%c0_25, %c0_26, %c0_27], %69 {strides = array<i32>} : memref<1x8x128xf32, #tpu.memory_space<vmem>>, vector<1x8x128xf32>,
    return
  }
  func.func @transform_0(%arg0: i32, %arg1: i32, %arg2: memref<2xi32, #tpu.memory_space<smem>>) -> (i32, i32, i32) {
    %c1_i32 = arith.constant 1 : i32
    %0 = arith.muli %arg1, %c1_i32 : i32
    %c1_i32_0 = arith.constant 1 : i32
    %1 = arith.subi %0, %c1_i32_0 : i32
    %c0_i32 = arith.constant 0 : i32
    %2 = arith.maxsi %1, %c0_i32 : i32
    %c0_i32_1 = arith.constant 0 : i32
    %c0_i32_2 = arith.constant 0 : i32
    return %arg0, %2, %c0_i32_1 : i32, i32, i32
  }
  func.func @transform_1(%arg0: i32, %arg1: i32, %arg2: memref<2xi32, #tpu.memory_space<smem>>) -> (i32, i32, i32) {
    %c0_i32 = arith.constant 0 : i32
    %c0_i32_0 = arith.constant 0 : i32
    return %arg0, %arg1, %c0_i32 : i32, i32, i32
  }
  func.func @transform_2(%arg0: i32, %arg1: i32, %arg2: memref<2xi32, #tpu.memory_space<smem>>) -> (i32, i32, i32) {
    %c1_i32 = arith.constant 1 : i32
    %0 = arith.addi %arg1, %c1_i32 : i32
    %c1_i32_0 = arith.constant 1 : i32
    %1 = arith.muli %0, %c1_i32_0 : i32
    %c1_i32_1 = arith.constant 1 : i32
    %2 = arith.minsi %1, %c1_i32_1 : i32
    %c0_i32 = arith.constant 0 : i32
    %c0_i32_2 = arith.constant 0 : i32
    return %arg0, %2, %c0_i32 : i32, i32, i32
  }
  func.func @transform_3(%arg0: i32, %arg1: i32, %arg2: memref<2xi32, #tpu.memory_space<smem>>) -> (i32, i32, i32) {
    %c0_i32 = arith.constant 0 : i32
    %c0_i32_0 = arith.constant 0 : i32
    %c0_i32_1 = arith.constant 0 : i32
    %c0_i32_2 = arith.constant 0 : i32
    return %c0_i32, %c0_i32_0, %c0_i32_1 : i32, i32, i32
  }
  func.func @transform_4(%arg0: i32, %arg1: i32, %arg2: memref<2xi32, #tpu.memory_space<smem>>) -> (i32, i32, i32) {
    %c0_i32 = arith.constant 0 : i32
    %c0_i32_0 = arith.constant 0 : i32
    %c0_i32_1 = arith.constant 0 : i32
    %c0_i32_2 = arith.constant 0 : i32
    return %c0_i32, %c0_i32_0, %c0_i32_1 : i32, i32, i32
  }
  func.func @transform_5(%arg0: i32, %arg1: i32, %arg2: memref<2xi32, #tpu.memory_space<smem>>) -> (i32, i32, i32) {
    %c0_i32 = arith.constant 0 : i32
    %c0_i32_0 = arith.constant 0 : i32
    return %arg0, %arg1, %c0_i32 : i32, i32, i32
  }
}

module attributes {stable_mosaic.version = 11 : i64} {
  func.func @_resblock2_kernel(%arg0: i32, %arg1: i32, %arg2: memref<2xi32, #tpu.memory_space<smem>>, %arg3: memref<1x8x128xf32, #tpu.memory_space<vmem>>, %arg4: memref<1x8x128xf32, #tpu.memory_space<vmem>>, %arg5: memref<1x8x128xf32, #tpu.memory_space<vmem>>, %arg6: memref<2x384x128xbf16, #tpu.memory_space<vmem>>, %arg7: memref<2x1x128xf32, #tpu.memory_space<vmem>>, %arg8: memref<1x8x128xf32, #tpu.memory_space<vmem>>) attributes {dimension_semantics = [#tpu.dimension_semantics<parallel>, #tpu.dimension_semantics<parallel>], iteration_bounds = array<i64: 2, 2>, scalar_prefetch = 1 : i64, scratch_operands = 0 : i64, tpu.core_type = #tpu.core_type<tc>, window_params = [{transform_indices = @transform_0, window_bounds = array<i64: 1, 8, 128>}, {transform_indices = @transform_1, window_bounds = array<i64: 1, 8, 128>}, {transform_indices = @transform_2, window_bounds = array<i64: 1, 8, 128>}, {pipeline_mode = #tpu.pipeline_mode<synchronous>, transform_indices = @transform_3, window_bounds = array<i64: 2, 384, 128>}, {pipeline_mode = #tpu.pipeline_mode<synchronous>, transform_indices = @transform_4, window_bounds = array<i64: 2, 1, 128>}, {transform_indices = @transform_5, window_bounds = array<i64: 1, 8, 128>}]} {
    %0 = arith.index_cast %arg0 : i32 to index
    %1 = memref.load %arg2[%0] : memref<2xi32, #tpu.memory_space<smem>>
    %c0 = arith.constant 0 : index
    %c0_0 = arith.constant 0 : index
    %c0_1 = arith.constant 0 : index
    %2 = vector.load %arg3[%c0, %c0_0, %c0_1] : memref<1x8x128xf32, #tpu.memory_space<vmem>>, vector<1x8x128xf32>
    %3 = vector.shape_cast %2 : vector<1x8x128xf32> to vector<8x128xf32>
    %c0_2 = arith.constant 0 : index
    %c0_3 = arith.constant 0 : index
    %c0_4 = arith.constant 0 : index
    %4 = vector.load %arg4[%c0_2, %c0_3, %c0_4] : memref<1x8x128xf32, #tpu.memory_space<vmem>>, vector<1x8x128xf32>
    %5 = vector.shape_cast %4 : vector<1x8x128xf32> to vector<8x128xf32>
    %c0_5 = arith.constant 0 : index
    %c0_6 = arith.constant 0 : index
    %c0_7 = arith.constant 0 : index
    %6 = vector.load %arg5[%c0_5, %c0_6, %c0_7] : memref<1x8x128xf32, #tpu.memory_space<vmem>>, vector<1x8x128xf32>
    %7 = vector.shape_cast %6 : vector<1x8x128xf32> to vector<8x128xf32>
    %8 = tpu.concatenate %3, %5, %7 in 0 : vector<8x128xf32>, vector<8x128xf32>, vector<8x128xf32> -> vector<24x128xf32>
    %9 = tpu.iota {dimensions = array<i32: 0>} : vector<24x1xi32>
    %c8_i32 = arith.constant 8 : i32
    %10 = arith.muli %arg1, %c8_i32 : i32
    %c8_i32_8 = arith.constant 8 : i32
    %11 = arith.subi %10, %c8_i32_8 : i32
    %12 = vector.broadcast %11 : i32 to vector<24x1xi32>
    %13 = arith.addi %12, %9 : vector<24x1xi32>
    %c0_i32 = arith.constant 0 : i32
    %14 = vector.broadcast %c0_i32 : i32 to vector<24x1xi32>
    %15 = arith.cmpi sge, %13, %14 : vector<24x1xi32>
    %16 = vector.broadcast %1 : i32 to vector<24x1xi32>
    %17 = arith.cmpi slt, %13, %16 : vector<24x1xi32>
    %18 = arith.andi %15, %17 : vector<24x1xi1>
    %19 = arith.extui %18 : vector<24x1xi1> to vector<24x1xi32>
    %20 = arith.sitofp %19 : vector<24x1xi32> to vector<24x1xf32>
    %cst = arith.constant 0.000000e+00 : f32
    %21 = vector.broadcast %cst : f32 to vector<24x128xf32>
    %22 = arith.cmpf ogt, %8, %21 : vector<24x128xf32>
    %cst_9 = arith.constant 1.000000e-01 : f32
    %23 = vector.broadcast %cst_9 : f32 to vector<24x128xf32>
    %24 = arith.mulf %23, %8 : vector<24x128xf32>
    %25 = arith.select %22, %8, %24 : vector<24x128xi1>, vector<24x128xf32>
    %26 = vector.broadcast %20 : vector<24x1xf32> to vector<24x128xf32>
    %27 = arith.mulf %25, %26 : vector<24x128xf32>
    %c1_i32 = arith.constant 1 : i32
    %28 = tpu.dynamic_rotate %27 by %c1_i32 dim 0 : vector<24x128xf32>, i32 -> vector<24x128xf32>
    %29 = arith.truncf %28 : vector<24x128xf32> to vector<24x128xbf16>
    %30 = arith.truncf %27 : vector<24x128xf32> to vector<24x128xbf16>
    %c23_i32 = arith.constant 23 : i32
    %31 = tpu.dynamic_rotate %27 by %c23_i32 dim 0 : vector<24x128xf32>, i32 -> vector<24x128xf32>
    %32 = arith.truncf %31 : vector<24x128xf32> to vector<24x128xbf16>
    %33 = tpu.concatenate %29, %30, %32 in 1 : vector<24x128xbf16>, vector<24x128xbf16>, vector<24x128xbf16> -> vector<24x384xbf16>
    %c0_10 = arith.constant 0 : index
    %c0_11 = arith.constant 0 : index
    %c0_12 = arith.constant 0 : index
    %34 = vector.load %arg6[%c0_10, %c0_11, %c0_12] : memref<2x384x128xbf16, #tpu.memory_space<vmem>>, vector<1x384x128xbf16>
    %35 = vector.shape_cast %34 : vector<1x384x128xbf16> to vector<384x128xbf16>
    %cst_13 = arith.constant dense<0.000000e+00> : vector<24x128xf32>
    %36 = tpu.matmul %33, %35, %cst_13 {dimension_numbers = #tpu.dot_dimension_numbers<[1], [0], [0], [1], [0, 0, 1, 1], [], []>} : vector<24x384xbf16>, vector<384x128xbf16>, vector<24x128xf32> -> vector<24x128xf32>
    %c0_14 = arith.constant 0 : index
    %c0_15 = arith.constant 0 : index
    %c0_16 = arith.constant 0 : index
    %37 = vector.load %arg7[%c0_14, %c0_15, %c0_16] : memref<2x1x128xf32, #tpu.memory_space<vmem>>, vector<1x1x128xf32>
    %38 = vector.shape_cast %37 : vector<1x1x128xf32> to vector<1x128xf32>
    %39 = vector.broadcast %38 : vector<1x128xf32> to vector<24x128xf32>
    %40 = arith.addf %36, %39 : vector<24x128xf32>
    %41 = arith.addf %40, %8 : vector<24x128xf32>
    %cst_17 = arith.constant 0.000000e+00 : f32
    %42 = vector.broadcast %cst_17 : f32 to vector<24x128xf32>
    %43 = arith.cmpf ogt, %41, %42 : vector<24x128xf32>
    %cst_18 = arith.constant 1.000000e-01 : f32
    %44 = vector.broadcast %cst_18 : f32 to vector<24x128xf32>
    %45 = arith.mulf %44, %41 : vector<24x128xf32>
    %46 = arith.select %43, %41, %45 : vector<24x128xi1>, vector<24x128xf32>
    %47 = vector.broadcast %20 : vector<24x1xf32> to vector<24x128xf32>
    %48 = arith.mulf %46, %47 : vector<24x128xf32>
    %c3_i32 = arith.constant 3 : i32
    %49 = tpu.dynamic_rotate %48 by %c3_i32 dim 0 : vector<24x128xf32>, i32 -> vector<24x128xf32>
    %50 = arith.truncf %49 : vector<24x128xf32> to vector<24x128xbf16>
    %51 = arith.truncf %48 : vector<24x128xf32> to vector<24x128xbf16>
    %c21_i32 = arith.constant 21 : i32
    %52 = tpu.dynamic_rotate %48 by %c21_i32 dim 0 : vector<24x128xf32>, i32 -> vector<24x128xf32>
    %53 = arith.truncf %52 : vector<24x128xf32> to vector<24x128xbf16>
    %54 = tpu.concatenate %50, %51, %53 in 1 : vector<24x128xbf16>, vector<24x128xbf16>, vector<24x128xbf16> -> vector<24x384xbf16>
    %c1 = arith.constant 1 : index
    %c0_19 = arith.constant 0 : index
    %c0_20 = arith.constant 0 : index
    %55 = vector.load %arg6[%c1, %c0_19, %c0_20] : memref<2x384x128xbf16, #tpu.memory_space<vmem>>, vector<1x384x128xbf16>
    %56 = vector.shape_cast %55 : vector<1x384x128xbf16> to vector<384x128xbf16>
    %cst_21 = arith.constant dense<0.000000e+00> : vector<24x128xf32>
    %57 = tpu.matmul %54, %56, %cst_21 {dimension_numbers = #tpu.dot_dimension_numbers<[1], [0], [0], [1], [0, 0, 1, 1], [], []>} : vector<24x384xbf16>, vector<384x128xbf16>, vector<24x128xf32> -> vector<24x128xf32>
    %c1_22 = arith.constant 1 : index
    %c0_23 = arith.constant 0 : index
    %c0_24 = arith.constant 0 : index
    %58 = vector.load %arg7[%c1_22, %c0_23, %c0_24] : memref<2x1x128xf32, #tpu.memory_space<vmem>>, vector<1x1x128xf32>
    %59 = vector.shape_cast %58 : vector<1x1x128xf32> to vector<1x128xf32>
    %60 = vector.broadcast %59 : vector<1x128xf32> to vector<24x128xf32>
    %61 = arith.addf %57, %60 : vector<24x128xf32>
    %62 = arith.addf %61, %41 : vector<24x128xf32>
    %63 = vector.extract_strided_slice %62 {offsets = [8, 0], sizes = [8, 128], strides = [1, 1]} : vector<24x128xf32> to vector<8x128xf32>
    %64 = vector.extract_strided_slice %20 {offsets = [8, 0], sizes = [8, 1], strides = [1, 1]} : vector<24x1xf32> to vector<8x1xf32>
    %65 = vector.broadcast %64 : vector<8x1xf32> to vector<8x128xf32>
    %66 = arith.mulf %63, %65 : vector<8x128xf32>
    %c0_25 = arith.constant 0 : index
    %c0_26 = arith.constant 0 : index
    %c0_27 = arith.constant 0 : index
    %67 = vector.load %arg8[%c0_25, %c0_26, %c0_27] : memref<1x8x128xf32, #tpu.memory_space<vmem>>, vector<1x8x128xf32>
    %68 = vector.shape_cast %67 : vector<1x8x128xf32> to vector<8x128xf32>
    %69 = vector.shape_cast %66 : vector<8x128xf32> to vector<1x8x128xf32>
    tpu.vector_store %arg8[%c0_25, %c0_26, %c0_27], %69 {strides = array<i32>} : memref<1x8x128xf32, #tpu.memory_space<vmem>>, vector<1x8x128xf32>,
    return
  }
  func.func @transform_0(%arg0: i32, %arg1: i32, %arg2: memref<2xi32, #tpu.memory_space<smem>>) -> (i32, i32, i32) {
    %c1_i32 = arith.constant 1 : i32
    %0 = arith.muli %arg1, %c1_i32 : i32
    %c1_i32_0 = arith.constant 1 : i32
    %1 = arith.subi %0, %c1_i32_0 : i32
    %c0_i32 = arith.constant 0 : i32
    %2 = arith.maxsi %1, %c0_i32 : i32
    %c0_i32_1 = arith.constant 0 : i32
    %c0_i32_2 = arith.constant 0 : i32
    return %arg0, %2, %c0_i32_1 : i32, i32, i32
  }
  func.func @transform_1(%arg0: i32, %arg1: i32, %arg2: memref<2xi32, #tpu.memory_space<smem>>) -> (i32, i32, i32) {
    %c0_i32 = arith.constant 0 : i32
    %c0_i32_0 = arith.constant 0 : i32
    return %arg0, %arg1, %c0_i32 : i32, i32, i32
  }
  func.func @transform_2(%arg0: i32, %arg1: i32, %arg2: memref<2xi32, #tpu.memory_space<smem>>) -> (i32, i32, i32) {
    %c1_i32 = arith.constant 1 : i32
    %0 = arith.addi %arg1, %c1_i32 : i32
    %c1_i32_0 = arith.constant 1 : i32
    %1 = arith.muli %0, %c1_i32_0 : i32
    %c1_i32_1 = arith.constant 1 : i32
    %2 = arith.minsi %1, %c1_i32_1 : i32
    %c0_i32 = arith.constant 0 : i32
    %c0_i32_2 = arith.constant 0 : i32
    return %arg0, %2, %c0_i32 : i32, i32, i32
  }
  func.func @transform_3(%arg0: i32, %arg1: i32, %arg2: memref<2xi32, #tpu.memory_space<smem>>) -> (i32, i32, i32) {
    %c0_i32 = arith.constant 0 : i32
    %c0_i32_0 = arith.constant 0 : i32
    %c0_i32_1 = arith.constant 0 : i32
    %c0_i32_2 = arith.constant 0 : i32
    return %c0_i32, %c0_i32_0, %c0_i32_1 : i32, i32, i32
  }
  func.func @transform_4(%arg0: i32, %arg1: i32, %arg2: memref<2xi32, #tpu.memory_space<smem>>) -> (i32, i32, i32) {
    %c0_i32 = arith.constant 0 : i32
    %c0_i32_0 = arith.constant 0 : i32
    %c0_i32_1 = arith.constant 0 : i32
    %c0_i32_2 = arith.constant 0 : i32
    return %c0_i32, %c0_i32_0, %c0_i32_1 : i32, i32, i32
  }
  func.func @transform_5(%arg0: i32, %arg1: i32, %arg2: memref<2xi32, #tpu.memory_space<smem>>) -> (i32, i32, i32) {
    %c0_i32 = arith.constant 0 : i32
    %c0_i32_0 = arith.constant 0 : i32
    return %arg0, %arg1, %c0_i32 : i32, i32, i32
  }
}

</mosaic_0001>

<bundles_post_ra>
// kernel: tpu_custom_call.1
= control target key start
LH: loop header
LB: loop body
LE: loop exit
PB: predicated region body
PF: predicated region fallthrough
CT: control target
= control target key end

     0   :  { %s2511_s0 = inlined_call_operand.hbm [shape: s32[2], index: 0, kind: input, shape index: {}]   ;;  %s2512_s1 = inlined_call_operand.hbm [shape: f32[2,16,128], index: 1, kind: input, shape index: {}]   ;;  %s2513_s2 = inlined_call_operand.hbm [shape: f32[2,16,128], index: 2, kind: input, shape index: {}]   ;;  %s2514_s3 = inlined_call_operand.hbm [shape: f32[2,16,128], index: 3, kind: input, shape index: {}]   ;;  %s2515_s4 = inlined_call_operand.hbm [shape: bf16[2,384,128], index: 4, kind: input, shape index: {}]   ;;  %s2516_s5 = inlined_call_operand.vmem [shape: f32[2,1,128], index: 5, kind: input, shape index: {}]   ;;  %s2517_s6 = inlined_call_operand.hbm [shape: f32[2,16,128], index: 6, kind: output, shape index: {}]  }
   0x1   :  { %2538 = sst [smem:[#allocation27_spill]] %s2513_s2  ;;  %s1627_s23 = scalar_lea.hbm %s2511_s0, 16 }
   0x2   :  { %2539 = sst [smem:[#allocation28_spill]] %s2515_s4  ;;  %p1628_p0 = scmp.ne.s32.totalorder %s2511_s0, %s1627_s23 }
   0x3   :  { %2540 = sst [smem:[#allocation29_spill]] %s2516_s5  ;;  %p1631_p1 = scmp.lt.u32.totalorder %s1627_s23, %s2511_s0 }
   0x4   :  { %2541 = sst [smem:[#allocation30_spill]] %s2517_s6 }
   0x5   :  { %p1633_p2 = pnand %p1631_p1, %p1628_p0 }
   0x7   :  { %1636 = shalt.err (!%p1633_p2)  }
   0x8   :  { %s1921_s28 = smov [#allocation3]  }
   0x9   :  { %12 = dma.hbm_to_smem %s2511_s0, 16, %s1921_s28, [#allocation2] }
   0xa   :  { %1839 = dma.done.wait [#allocation2], 16 }
   0xb   :  { %1840 = vsyncadd [#allocation2], 4294967280 }
   0xc   :  { %14 = sfence }
   0xd   :  { %15 = vsyncpa [#allocation5], 0 }
   0xe   :  { %17 = vsyncpa [#allocation5 + $0x1], 0 }
   0xf   :  { %18 = vsyncpa [#allocation8], 0 }
  0x10   :  { %20 = vsyncpa [#allocation8 + $0x1], 0 }
  0x11   :  { %21 = vsyncpa [#allocation11], 0 }
  0x12   :  { %22 = vsyncpa [#allocation6], 0 }
  0x13   :  { %24 = vsyncpa [#allocation6 + $0x1], 0  ;;  %s1977_s7 = smov 0   ;;  %s1979_s8 = smov 0  }
  0x14   :  { %s1981_s9 = smov 0   ;;  %s1983_s10 = smov 0  }
  0x15   :  { %s1985_s11 = smov 0   ;;  %s1987_s0 = smov 0  }
  0x16   :  { %s1989_s12 = smov 0   ;;  %s1991_s13 = smov 0  }
  0x17   :  { %s1993_s14 = smov 0   ;;  %s1995_s15 = smov 0  }
  0x18   :  { %s1997_s16 = smov 0   ;;  %s1999_s17 = smov 0  }
  0x19   :  { %s2001_s18 = smov 0   ;;  %s2003_s19 = smov 0  }
  0x1a LB: > { %2542 = sst [smem:[#allocation19_spill]] %s1879_s10  ;;  %s2048_s20 = sadd.s32 4294967295, %s1919_s19   ;;  %s1919_s19 = sphi %s2003_s19, %s30_s19   ;;  %s1915_s18 = sphi %s2001_s18, %s2606_s18   ;;  %s1911_s17 = sphi %s1999_s17, %s2605_s17   ;;  %s1907_s16 = sphi %s1997_s16, %s2604_s16   ;;  %s1903_s15 = sphi %s1995_s15, %s2603_s15   ;;  %s1899_s14 = sphi %s1993_s14, %s2602_s14   ;;  %s1895_s13 = sphi %s1991_s13, %s2601_s13   ;;  %s1891_s12 = sphi %s1989_s12, %s2600_s12   ;;  %s1887_s0 = sphi %s1987_s0, %s2599_s0   ;;  %s1883_s11 = sphi %s1985_s11, %s2598_s11   ;;  %s1879_s10 = sphi %s1983_s10, %s2597_s10   ;;  %s1875_s9 = sphi %s1981_s9, %s2596_s9   ;;  %s1871_s8 = sphi %s1979_s8, %s2595_s8   ;;  %s1867_s7 = sphi %s1977_s7, %s2594_s7  }
  0x1b   : > { %2543 = sst [smem:[#allocation20_spill]] %s1903_s15  ;;  %s1229_s21 = sadd.s32 4294967294, %s1919_s19  }
  0x1c   : > { %2544 = sst [smem:[#allocation21_spill]] %s1907_s16  ;;  %s39_s22 = sadd.s32 1, %s1911_s17 }
  0x1d   : > { %s42_s23 = sadd.s32 1, %s1915_s18  ;;  %p40_p3 = scmp.ge.s32.totalorder %s39_s22, 2 }
  0x1e   : > { %p2529_p4 = scmp.eq.s32.totalorder %s1919_s19, 0  ;;  %p2530_p5 = scmp.eq.s32.totalorder %s2048_s20, 0 }
  0x1f   : > { %s2608_s22 = smov (%p40_p3, %s39_s22), 0  ;;  %s2610_s23 = smov (!%p40_p3, %s42_s23), %s1915_s18 }
  0x20   : > { %2545 = sst [smem:[#allocation22_spill]] %s2608_s22  ;;  %p92_p6 = scmp.ne.s32.totalorder %s1887_s0, %s1883_s11 }
  0x21   : > { %p98_p7 = scmp.ne.s32.totalorder %s1883_s11, %s1879_s10  ;;  %p200_p8 = scmp.eq.s32.totalorder %s2048_s20, 3 }
  0x22   : > { %p2070_p9 = por %p92_p6, %p2529_p4  ;;  %p206_p10 = scmp.eq.s32.totalorder %s1229_s21, 3 }
  0x23   : > { %p2076_p11 = por %p98_p7, %p2530_p5  ;;  %p2080_p12 = por %p200_p8, %p92_p6 }
  0x24   : > { %p2084_p13 = por %p206_p10, %p98_p7  ;;  %p2528_p0 = scmp.lt.s32.totalorder %s1919_s19, 4 }
  0x25   : > { %s2547_s27 = scalar_select %p2076_p11, 1, 0 }
  0x26   : > { %s2549_s28 = scalar_select %p2080_p12, 1, 0 }
  0x27   : > { %2548 = sst [smem:[#allocation23_spill]] %s2547_s27  ;;  %s1237_s30 = sshll.u32 %s1915_s18, 1 }
  0x28   : > { %2550 = sst [smem:[#allocation24_spill]] %s2549_s28  ;;  %s265_s24 = sand.u32 1, %s1919_s19  }
  0x29   : > { %s2551_s29 = scalar_select %p2084_p13, 1, 0 }
  0x2a   : > { %s267_s25 = sand.u32 1, %s1887_s0   ;;  %s274_s6 = sadd.s32 %s1911_s17, %s1237_s30 }
  0x2b   : > { %2552 = sst [smem:[#allocation25_spill]] %s2551_s29  ;;  %s1239_s10 = sshll.u32 %s267_s25, 3 }
  0x2c   : > { %s1241_s21 = sshll.u32 %s274_s6, 7  ;;  %s2553_s2 = sld [smem:[#allocation27_spill]] }
  0x2d   : > { %s269_s28 = scalar_lea.vmem [#allocation7], %s1239_s10  ;;  %p2104_p1 = pnand %p2528_p0, %p2070_p9 }
  0x2e   : > { %s278_s27 = sshll.u32 %s269_s28, 4  ;;  %s2108_s6 = scalar_lea.sflag [#allocation8], %s265_s24  ;;  %s2098_s27 = int_to_ptr.vmem [resolvable:$true] %s278_s27 }
  0x2f   : > { %p1639_p3 = pneg %p2104_p1 }
  0x32   : > { %s2096_s15 = scalar_lea.hbm %s2553_s2, %s1241_s21  ;;  %s1642_s25 = scalar_lea.hbm %s2553_s2, 512 }
  0x33   : > { %s1637_s5 = scalar_lea.hbm %s2096_s15, 128  ;;  %p1643_p8 = scmp.lt.u32.totalorder %s2096_s15, %s2553_s2 }
  0x34   : > { %p1638_p2 = scmp.ne.s32.totalorder %s2096_s15, %s1637_s5  ;;  %p1644_p9 = scmp.lt.u32.totalorder %s1642_s25, %s1637_s5 }
  0x35   : > { %p1646_p0 = scmp.lt.u32.totalorder %s1637_s5, %s2096_s15 }
  0x36   : > { %p1640_p6 = pnand %p1639_p3, %p1638_p2  ;;  %p1645_p10 = por %p1644_p9, %p1643_p8 }
  0x38   : > { %p1641_p7 = pneg %p1640_p6  ;;  %p1647_p4 = por %p1646_p0, %p1645_p10 }
  0x3a   : > { %p1648_p5 = pnand %p1647_p4, %p1641_p7 }
  0x3c   : > { %1651 = shalt.err (!%p1648_p5)
}
  0x3d   : > { %s1652_s24 = scalar_lea.vmem %s2098_s27, 128  ;;  %s1922_s30 = smov [#allocation7]  }
  0x3e   : > { %p1653_p2 = scmp.ne.s32.totalorder %s2098_s27, %s1652_s24  ;;  %s1657_s21 = sshll.u32 %s1922_s30, 4  ;;  %s1658_s21 = int_to_ptr.vmem [resolvable:$false] %s1657_s21 }
  0x3f   : > { %s1659_s10 = scalar_lea.vmem %s1658_s21, 256  ;;  %p1660_p12 = scmp.lt.s32.totalorder %s2098_s27, %s1658_s21 }
  0x40   : > { %p1655_p6 = pnand %p1653_p2, %p1639_p3  ;;  %p1661_p8 = scmp.lt.s32.totalorder %s1659_s10, %s1652_s24 }
  0x42   : > { %p1656_p13 = pneg %p1655_p6  ;;  %p1662_p9 = por %p1661_p8, %p1660_p12 }
  0x44   : > { %p1663_p0 = pnand %p1662_p9, %p1656_p13 }
  0x46   : > { %1666 = shalt.err (!%p1663_p0)
}
  0x47   : > { %1450 = dma.hbm_to_vmem [thread:$0]  (!%p2104_p1), %s2096_s15, 128, %s2098_s27, %s2108_s6  }
  0x48   : > { %p1232_p4 = scmp.ge.s32.totalorder %s1919_s19, 1  ;;  %p213_p5 = scmp.lt.s32.totalorder %s1919_s19, 5 }
  0x49   : > { %s1923_s5 = smov [#allocation10]   ;;  %p2556_p13 = scmp.eq.s32.totalorder %s2048_s20, 0 }
  0x4a   : > { %s225_s16 = sshll.u32 %s1923_s5, 4  ;;  %p2138_p3 = pnand %p1232_p4, %p213_p5  ;;  %s226_s16 = int_to_ptr.vmem [resolvable:$true] %s225_s16 }
  0x4b   : > { %s2558_s4 = sld [smem:[#allocation28_spill]] }
  0x4c   : > { %s2555_s25 = scalar_select %p2138_p3, 1, 0 }
  0x4d   : > { %p1440_p12 = pneg %p2138_p3 }
  0x4f   : > { %p2146_p7 = pnand %p1440_p12, %p2556_p13 }
  0x51   : > { %s1667_s26 = scalar_lea.hbm %s2558_s4, 6144  ;;  %p1669_p2 = pneg %p2146_p7 }
  0x52   : > { %p1668_p1 = scmp.ne.s32.totalorder %s2558_s4, %s1667_s26  ;;  %p1674_p9 = scmp.lt.u32.totalorder %s1667_s26, %s2558_s4 }
  0x54   : > { %p1670_p6 = pnand %p1669_p2, %p1668_p1 }
  0x56   : > { %p1671_p8 = pneg %p1670_p6 }
  0x58   : > { %p1676_p0 = pnand %p1674_p9, %p1671_p8 }
  0x5a   : > { %1679 = shalt.err (!%p1676_p0)
}
  0x5b   : > { %s1680_s10 = scalar_lea.vmem %s226_s16, 6144  ;;  %p1688_p13 = scmp.lt.s32.totalorder %s226_s16, %s226_s16 }
  0x5c   : > { %p1681_p4 = scmp.ne.s32.totalorder %s226_s16, %s1680_s10  ;;  %p1689_p10 = scmp.lt.s32.totalorder %s1680_s10, %s1680_s10 }
  0x5e   : > { %p1683_p5 = pnand %p1681_p4, %p1669_p2  ;;  %p1690_p11 = por %p1689_p10, %p1688_p13 }
  0x60   : > { %p1684_p12 = pneg %p1683_p5 }
  0x62   : > { %p1691_p3 = pnand %p1690_p11, %p1684_p12 }
  0x64   : > { %1694 = shalt.err (!%p1691_p3)
}
  0x65   : > { %s1924_s5 = smov 64   ;;  %s1925_s15 = smov 4  }
  0x66   : > { %1443 = dma.hbm_to_vmem [thread:$0]  (!%p2146_p7), %s2558_s4, 6144, %s226_s16, [#allocation11], %s1924_s5, %s1924_s5, %s1925_s15  }
  0x67   : > { %p2559_p11 = scmp.ge.s32.totalorder %s2610_s23, 2  ;;  %s57_s24 = sadd.s32 1, %s1899_s14 }
  0x68   : > { %p64_p3 = scmp.ne.s32.totalorder %s1899_s14, %s1895_s13  ;;  %p70_p10 = scmp.ne.s32.totalorder %s1895_s13, %s1891_s12 }
  0x69   : > { %s2612_s23 = smov (%p2559_p11, %s2610_s23), 0  ;;  %p2561_p1 = scmp.eq.s32.totalorder %s1919_s19, 0 }
  0x6a   : > { %2560 = sst [smem:[#allocation26_spill]] %s2612_s23  ;;  %s2174_s28 = ssub.s32 %s1915_s18, %s2612_s23 }
  0x6b   : > { %p2183_p2 = por %p2561_p1, %p64_p3  ;;  %p2536_p7 = scmp.eq.s32.totalorder %s2174_s28, 0 }
  0x6c   : > { %p2563_p6 = scmp.eq.s32.totalorder %s2048_s20, 0  ;;  %s2565_s30 = ssub.s32 %s1911_s17, %s2608_s22 }
  0x6d   : > { %s82_s21 = sor.u32 %s2565_s30, %s2174_s28  ;;  %s242_s10 = sand.u32 1, %s1899_s14  }
  0x6e   : > { %p2190_p8 = por %p2563_p6, %p70_p10  ;;  %p83_p9 = scmp.eq.s32.totalorder %s82_s21, 0 }
  0x6f   : > { %s2202_s5 = scalar_select %p2536_p7, %s1899_s14, %s57_s24  }
  0x70   : > { %s1235_s12 = sshll.u32 %s242_s10, 3  ;;  %s2566_s15 = sadd.s32 1, %s1887_s0 }
  0x71   : > { %s2207_s27 = scalar_select %p83_p9, %s1887_s0, %s2566_s15  }
  0x72   : > { %s1861_s26 = sshll.u32 %s1915_s18, 8  ;;  %s246_s30 = scalar_lea.vmem [#allocation4], %s1235_s12 }
  0x73   : > { %s2215_s23 = scalar_lea.hbm %s2512_s1, %s1861_s26  ;;  %s258_s22 = sshll.u32 %s246_s30, 4  ;;  %s2217_s22 = int_to_ptr.vmem [resolvable:$true] %s258_s22 }
  0x74   : > { %p2567_p0 = scmp.lt.s32.totalorder %s1919_s19, 4  ;;  %s243_s21 = scalar_lea.sflag [#allocation5], %s242_s10 }
  0x75   : > { %s1695_s2 = scalar_lea.hbm %s2215_s23, 128  ;;  %s1700_s29 = scalar_lea.hbm %s2512_s1, 512 }
  0x76   : > { %p2223_p4 = pnand %p2567_p0, %p2183_p2  ;;  %p1696_p5 = scmp.ne.s32.totalorder %s2215_s23, %s1695_s2 }
  0x77   : > { %p1701_p3 = scmp.lt.u32.totalorder %s2215_s23, %s2512_s1  ;;  %p1702_p10 = scmp.lt.u32.totalorder %s1700_s29, %s1695_s2 }
  0x78   : > { %p1697_p12 = pneg %p2223_p4  ;;  %p1704_p2 = scmp.lt.u32.totalorder %s1695_s2, %s2215_s23 }
  0x79   : > { %p1703_p1 = por %p1702_p10, %p1701_p3 }
  0x7a   : > { %p1698_p13 = pnand %p1697_p12, %p1696_p5 }
  0x7b   : > { %p1705_p6 = por %p1704_p2, %p1703_p1 }
  0x7c   : > { %p1699_p11 = pneg %p1698_p13 }
  0x7e   : > { %p1706_p9 = pnand %p1705_p6, %p1699_p11 }
  0x80   : > { %1709 = shalt.err (!%p1706_p9)
}
  0x81   : > { %s1710_s10 = scalar_lea.vmem %s2217_s22, 128  ;;  %s1926_s4 = smov [#allocation4]  }
  0x82   : > { %p1711_p0 = scmp.ne.s32.totalorder %s2217_s22, %s1710_s10  ;;  %s1715_s12 = sshll.u32 %s1926_s4, 4  ;;  %s1716_s12 = int_to_ptr.vmem [resolvable:$false] %s1715_s12 }
  0x83   : > { %s1717_s15 = scalar_lea.vmem %s1716_s12, 256  ;;  %p1718_p7 = scmp.lt.s32.totalorder %s2217_s22, %s1716_s12 }
  0x84   : > { %p1713_p5 = pnand %p1711_p0, %p1697_p12  ;;  %p1719_p3 = scmp.lt.s32.totalorder %s1717_s15, %s1710_s10 }
  0x86   : > { %p1714_p13 = pneg %p1713_p5  ;;  %p1720_p10 = por %p1719_p3, %p1718_p7 }
  0x88   : > { %p1721_p1 = pnand %p1720_p10, %p1714_p13 }
  0x8a   : > { %1724 = shalt.err (!%p1721_p1)
}
  0x8b   : > { %1447 = dma.hbm_to_vmem [thread:$0]  (!%p2223_p4), %s2215_s23, 128, %s2217_s22, %s243_s21  }
  0x8c   : > { %s119_s2 = sadd.s32 1, %s1875_s9  ;;  %p126_p7 = scmp.ne.s32.totalorder %s1875_s9, %s1871_s8 }
  0x8d   : > { %p132_p12 = scmp.ne.s32.totalorder %s1871_s8, %s1867_s7  ;;  %s287_s29 = sand.u32 1, %s1875_s9  }
  0x8e   : > { %p2569_p11 = scmp.eq.s32.totalorder %s1919_s19, 0  ;;  %p2570_p6 = scmp.eq.s32.totalorder %s2048_s20, 0 }
  0x8f   : > { %s1242_s30 = sshll.u32 %s287_s29, 3  ;;  %s1863_s10 = sadd.s32 128, %s1861_s26 }
  0x90   : > { %p128_p2 = por %p126_p7, %p2569_p11  ;;  %p2262_p9 = por %p132_p12, %p2570_p6 }
  0x91   : > { %s289_s4 = scalar_lea.vmem [#allocation9], %s1242_s30  ;;  %p2572_p0 = scmp.eq.s32.totalorder %s2174_s28, 0 }
  0x92   : > { %s2571_s24 = scalar_select %p2262_p9, 1, 0 }
  0x93   : > { %s301_s12 = sshll.u32 %s289_s4, 4  ;;  %s2276_s7 = scalar_lea.hbm %s2514_s3, %s1863_s10  ;;  %s2278_s12 = int_to_ptr.vmem [resolvable:$true] %s301_s12 }
  0x94   : > { %s2271_s15 = scalar_select %p2572_p0, %s1875_s9, %s119_s2  }
  0x95   : > { %p2573_p4 = scmp.lt.s32.totalorder %s1919_s19, 4  ;;  %s1725_s28 = scalar_lea.hbm %s2276_s7, 128 }
  0x96   : > { %p1726_p13 = scmp.ne.s32.totalorder %s2276_s7, %s1725_s28  ;;  %s1730_s29 = scalar_lea.hbm %s2514_s3, 512 }
  0x97   : > { %p2282_p5 = pnand %p2573_p4, %p128_p2  ;;  %p1731_p7 = scmp.lt.u32.totalorder %s2276_s7, %s2514_s3 }
  0x98   : > { %p1732_p12 = scmp.lt.u32.totalorder %s1730_s29, %s1725_s28  ;;  %p1734_p2 = scmp.lt.u32.totalorder %s1725_s28, %s2276_s7 }
  0x99   : > { %p1727_p3 = pneg %p2282_p5 }
  0x9a   : > { %p1733_p11 = por %p1732_p12, %p1731_p7 }
  0x9b   : > { %p1728_p10 = pnand %p1727_p3, %p1726_p13 }
  0x9c   : > { %p1735_p6 = por %p1734_p2, %p1733_p11 }
  0x9d   : > { %p1729_p1 = pneg %p1728_p10 }
  0x9f   : > { %p1736_p0 = pnand %p1735_p6, %p1729_p1 }
  0xa1   : > { %1739 = shalt.err (!%p1736_p0)
}
  0xa2   : > { %s1740_s4 = scalar_lea.vmem %s2278_s12, 128  ;;  %s1927_s22 = smov [#allocation9]  }
  0xa3   : > { %p1741_p4 = scmp.ne.s32.totalorder %s2278_s12, %s1740_s4  ;;  %s1745_s23 = sshll.u32 %s1927_s22, 4  ;;  %s1746_s23 = int_to_ptr.vmem [resolvable:$false] %s1745_s23 }
  0xa4   : > { %s1747_s26 = scalar_lea.vmem %s1746_s23, 256  ;;  %p1748_p9 = scmp.lt.s32.totalorder %s2278_s12, %s1746_s23 }
  0xa5   : > { %p1743_p13 = pnand %p1741_p4, %p1727_p3  ;;  %p1749_p7 = scmp.lt.s32.totalorder %s1747_s26, %s1740_s4 }
  0xa7   : > { %p1744_p10 = pneg %p1743_p13  ;;  %p1750_p12 = por %p1749_p7, %p1748_p9 }
  0xa9   : > { %p1751_p11 = pnand %p1750_p12, %p1744_p10 }
  0xab   : > { %1754 = shalt.err (!%p1751_p11)
}
  0xac   : > { %1453 = dma.hbm_to_vmem [thread:$0]  (!%p2282_p5), %s2276_s7, 128, %s2278_s12, %s2108_s6  }
  0xad   : > { %p2575_p1 = scmp.ne.s32.totalorder %s2555_s25, 0 }
  0xae   : > { %s312_s28 = sand.u32 (!%p2575_p1), 1, %s1895_s13  }
  0xaf   : > { %310 = sbr.rel (%p2575_p1) target bundleno = 710 (0x2c6), region = 40  ;;  %s2315_s2 = sshll.u32 (!%p2575_p1), %s312_s28, 3 }
  0xb0   : > { %s313_s29 = scalar_lea.sflag (!%p2575_p1), [#allocation5], %s312_s28  ;;  %s316_s30 = scalar_lea.vmem (!%p2575_p1), [#allocation4], %s2315_s2 }
  0xb6   : > { %1842 = dma.done.wait (%p2190_p8), %s313_s29, 128  }
  0xb7   : > { %1844 = vsyncadd (%p2190_p8), %s313_s29, 4294967168  ;;  %s2576_s6 = sld [smem:[#allocation23_spill]]  ;;  %s321_s12 = sand.u32 1, %s2048_s20  }
  0xb8   : > { %s323_s25 = sand.u32 1, %s1883_s11   ;;  %s322_s21 = scalar_lea.sflag [#allocation8], %s321_s12 }
  0xb9   : > { %s2326_s7 = sshll.u32 %s323_s25, 3 }
  0xba   : > { %s325_s10 = scalar_lea.vmem [#allocation7], %s2326_s7 }
  0xbd   : > { %p2577_p9 = scmp.ne.s32.totalorder %s2576_s6, 0 }
  0xbf   : > { %1846 = dma.done.wait (%p2577_p9), %s322_s21, 128  }
  0xc0   : > { %1848 = vsyncadd (%p2577_p9), %s322_s21, 4294967168  ;;  %s332_s16 = sand.u32 1, %s1871_s8   ;;  %p2578_p8 = scmp.ne.s32.totalorder %s2571_s24, 0 }
  0xc1   : > { %s2334_s4 = sshll.u32 %s332_s16, 3 }
  0xc2   : > { %s334_s22 = scalar_lea.vmem [#allocation9], %s2334_s4 }
  0xc3   : > { %1850 = dma.done.wait (%p2578_p8), %s322_s21, 128  }
  0xc4   : > { %1852 = vsyncadd (%p2578_p8), %s322_s21, 4294967168  ;;  %p2579_p5 = scmp.eq.s32.totalorder %s2048_s20, 0 }
  0xc6   : > { %1854 = dma.done.wait (%p2579_p5), [#allocation11], 6144   ;;  %p2580_p3 = pmov %p2579_p5 }
  0xc7   : > { %v1579_v0 = vld [vmem:[#allocation10 + $0x40] sm:$0xff]   ;;  %s2581_s23 = sld [smem:[#allocation20_spill]]  ;;  %v1581_v2 = vld [vmem:[#allocation10 + $0x48] sm:$0xff]   ;;  %s2582_s26 = sld [smem:[#allocation21_spill]]  ;;  %v1584_v5 = vld [vmem:[#allocation10 + $0x50] sm:$0xff]   ;;  %v386_v7 = vlaneseq  ;;  %v1928_v36 = vmov 0.0  }
  0xc8   : > { %1856 = vsyncadd (%p2580_p3), [#allocation11], 4294961152  ;;  %v1580_v1 = vld [vmem:[#allocation10] sm:$0xff]   ;;  %1312 = vmatprep.subr.bf16.mxu0 %v1579_v0  ;;  %v1583_v4 = vld [vmem:[#allocation10 + $0x8] sm:$0xff]   ;;  %s2584_s16 = sld [smem:[#allocation24_spill]]  ;;  %s1929_s29 = smov [#allocation12]  }
  0xc9   : > { %1313 = vmatpush3.bf16.msra.mxu0 %v1580_v1  ;;  %v1582_v3 = vld [vmem:[#allocation10 + $0x80] sm:$0xff]   ;;  %v1585_v6 = vld [vmem:[#allocation10 + $0x88] sm:$0xff]   ;;  %v1586_v8 = vld [vmem:[#allocation10 + $0x10] sm:$0xff]   ;;  %v2347_v12 = vshrl.u32 %v386_v7, 7  ;;  %s1759_s6 = sshll.u32 %s1929_s29, 4  ;;  %s1760_s6 = int_to_ptr.vmem [resolvable:$false] %s1759_s6 }
  0xca   : > { %1314 = vmatprep.subr.bf16.mxu0 %v1581_v2  ;;  %1388 = vmatprep.subr.bf16.mxu1 %v1582_v3  ;;  %v1587_v9 = vld [vmem:[#allocation10 + $0x58] sm:$0xff]   ;;  %v1588_v10 = vld [vmem:[#allocation10 + $0x90] sm:$0xff]   ;;  %v1590_v13 = vld [vmem:[#allocation10 + $0x60] sm:$0xff]   ;;  %s1761_s12 = scalar_lea.vmem %s1760_s6, 256 }
  0xcb   : > { %1389 = vmatpush3.bf16.msra.mxu1 %v1582_v3  ;;  %v1589_v11 = vld [vmem:[#allocation10 + $0x18] sm:$0xff]   ;;  %v1592_v15 = vld [vmem:[#allocation10 + $0x20] sm:$0xff]   ;;  %v388_v16 = vadd.s32 8, %v2347_v12  ;;  %v389_v19 = vadd.s32 16, %v2347_v12  ;;  %v1593_v20 = vld [vmem:[#allocation10 + $0x68] sm:$0xff]   ;;  %vm427_vm12 = vcmp.lt.s32.totalorder %v2347_v12, 1 }
  0xcc   : > { %1390 = vmatprep.subr.bf16.mxu1 %v1585_v6  ;;  %v1591_v14 = vld [vmem:[#allocation10 + $0x98] sm:$0xff]   ;;  %v1594_v18 = vld [vmem:[#allocation10 + $0xa0] sm:$0xff]   ;;  %v1595_v22 = vld [vmem:[#allocation10 + $0x28] sm:$0xff]   ;;  %vm438_vm13 = vcmp.lt.s32.totalorder %v2347_v12, 7 }
  0xcd   : > { %1315 = vmatpush3.bf16.msra.mxu0 %v1583_v4  ;;  %s1251_s20 = sshll.u32 %s2581_s23, 3  ;;  %s382_s24 = sld [smem:[#allocation3 + %s2582_s26]]  ;;  %v1597_v25 = vld [vmem:[#allocation10 + $0xa8] sm:$0xff]   ;;  %v1596_v27 = vld [vmem:[#allocation10 + $0x70] sm:$0xff]   ;;  %v1599_v33 = vld [vmem:[#allocation10 + $0x78] sm:$0xff]  }
  0xce   : > { %1316 = vmatprep.subr.bf16.mxu0 %v1584_v5  ;;  %s1252_s28 = sadd.s32 4294967288, %s1251_s20  ;;  %v1598_v28 = vld [vmem:[#allocation10 + $0x30] sm:$0xff]   ;;  %v2358_v31 = vld [vmem:[%s325_s10] sm:$0xff]  ;;  %v1601_v35 = vld [vmem:[#allocation10 + $0x38] sm:$0xff]   ;;  %s1308_s21 = sshll.u32 %s2582_s26, 1 }
  0xcf   : > { %1391 = vmatpush3.bf16.msra.mxu1 %v1585_v6  ;;  %v392_v17 = vstv %s1252_s28  ;;  %v1600_v29 = vld [vmem:[#allocation10 + $0xb0] sm:$0xff]   ;;  %vm413_vm8 = vcmp.gt.f32.partialorder %v2358_v31, 0.0  ;;  %v416_v38 = vmul.f32 0.1, %v2358_v31  ;;  %v1602_v46 = vld [vmem:[#allocation10 + $0xb8] sm:$0xff]   ;;  %v1603_v51 = vld [vmem:[#allocation10 + $0x100] sm:$0xff]   ;;  %s1082_s10 = sadd.s32 %s2581_s23, %s1308_s21 }
  0xd0   : > { %1392 = vmatprep.subr.bf16.mxu1 %v1588_v10  ;;  %v393_v21 = vadd.s32 %v392_v17, %v2347_v12  ;;  %v394_v23 = vadd.s32 %v392_v17, %v388_v16  ;;  %v395_v26 = vadd.s32 %v392_v17, %v389_v19  ;;  %v2354_v30 = vld [vmem:[%s316_s30] sm:$0xff]  ;;  %v1604_v57 = vld [vmem:[#allocation10 + $0xc0] sm:$0xff]   ;;  %v1606_v6 = vld [vmem:[#allocation10 + $0x108] sm:$0xff]   ;;  %s2583_s30 = sld [smem:[#allocation29_spill]]  ;;  %s1309_s4 = sshll.u32 %s1082_s10, 7 }
  0xd1   : > { %1317 = vmatpush3.bf16.msra.mxu0 %v1586_v8  ;;  %v2362_v32 = vld [vmem:[%s334_s22] sm:$0xff]  ;;  %vm412_vm7 = vcmp.gt.f32.partialorder %v2354_v30, 0.0  ;;  %v415_v34 = vmul.f32 0.1, %v2354_v30  ;;  %v419_v43 = vsel %vm413_vm8, %v2358_v31, %v416_v38  ;;  %v1605_v58 = vld [vmem:[#allocation10 + $0x140] sm:$0xff]   ;;  %v1607_v7 = vld [vmem:[#allocation10 + $0xc8] sm:$0xff]  }
  0xd2   : > { %1318 = vmatprep.subr.bf16.mxu0 %v1587_v9  ;;  %vm396_vm0 = vcmp.ge.s32.totalorder %v393_v21, 0  ;;  %vm397_vm2 = vcmp.ge.s32.totalorder %v394_v23, 0  ;;  %vm398_vm4 = vcmp.ge.s32.totalorder %v395_v26, 0  ;;  %vm414_vm9 = vcmp.gt.f32.partialorder %v2362_v32, 0.0  ;;  %v1608_v8 = vld [vmem:[#allocation10 + $0x148] sm:$0xff]   ;;  %v1609_v9 = vld [vmem:[#allocation10 + $0x110] sm:$0xff]  }
  0xd3   : > { %1393 = vmatpush3.bf16.msra.mxu1 %v1588_v10  ;;  %v399_v24 = vstv %s382_s24  ;;  %v417_v39 = vmul.f32 0.1, %v2362_v32  ;;  %v418_v41 = vsel %vm412_vm7, %v2354_v30, %v415_v34  ;;  %v1610_v10 = vld [vmem:[#allocation10 + $0xd0] sm:$0xff]   ;;  %v1615_v16 = vld [vmem:[#allocation10 + $0x120] sm:$0xff]   ;;  %v1618_v19 = vld [vmem:[#allocation10 + $0x128] sm:$0xff]   ;;  %s374_s22 = scalar_lea.vmem [#allocation12], %s2326_s7 }
  0xd4   : > { %1394 = vmatprep.subr.bf16.mxu1 %v1591_v14  ;;  %vm400_vm1 = vcmp.lt.s32.totalorder %v393_v21, %v399_v24  ;;  %vm401_vm3 = vcmp.lt.s32.totalorder %v394_v23, %v399_v24  ;;  %vm402_vm5 = vcmp.lt.s32.totalorder %v395_v26, %v399_v24  ;;  %v1616_v17 = vld [vmem:[#allocation10 + $0xe0] sm:$0xff]   ;;  %v1620_v21 = vld [vmem:[#allocation10 + $0x168] sm:$0xff]   ;;  %v1622_v23 = vld [vmem:[#allocation10 + $0xf0] sm:$0xff]   ;;  %s1086_s20 = sshll.u32 %s374_s22, 4  ;;  %s2585_s26 = sld [smem:[#allocation30_spill]]  ;;  %s2434_s20 = int_to_ptr.vmem [resolvable:$true] %s1086_s20 }
  0xd5   : > { %1319 = vmatpush3.bf16.msra.mxu0 %v1589_v11  ;;  %vm403_vm6 = vmand %vm396_vm0, %vm400_vm1  ;;  %v420_v44 = vsel %vm414_vm9, %v2362_v32, %v417_v39  ;;  %v1611_v11 = vld [vmem:[#allocation10 + $0x150] sm:$0xff]   ;;  %v1625_v26 = vld [vmem:[#allocation10 + $0xf8] sm:$0xff]   ;;  %vm757_vm1 = vcmp.lt.s32.totalorder %v2347_v12, 3  ;;  %s1071_s23 = scalar_lea.sflag [#allocation6], %s323_s25  ;;  %s1755_s7 = scalar_lea.vmem %s2434_s20, 128 }
  0xd6   : > { %1320 = vmatprep.subr.bf16.mxu0 %v1590_v13  ;;  %vm404_vm10 = vmand %vm397_vm2, %vm401_vm3  ;;  %v2371_v37 = vsel %vm403_vm6, 1.0, %v1928_v36  ;;  %v1612_v13 = vld [vmem:[#allocation10 + $0x118] sm:$0xff]   ;;  %v1623_v24 = vld [vmem:[#allocation10 + $0x170] sm:$0xff]   ;;  %vm768_vm2 = vcmp.lt.s32.totalorder %v2347_v12, 5  ;;  %p1756_p2 = scmp.ne.s32.totalorder %s2434_s20, %s1755_s7  ;;  %p2586_p6 = scmp.ne.s32.totalorder %s2584_s16, 0 }
  0xd7   : > { %1395 = vmatpush3.bf16.msra.mxu1 %v1591_v14  ;;  %vm405_vm11 = vmand %vm398_vm4, %vm402_vm5  ;;  %v2377_v40 = vsel %vm404_vm10, 1.0, %v1928_v36  ;;  %v421_v45 = vmul.f32 %v2371_v37, %v418_v41  ;;  %v1613_v14 = vld [vmem:[#allocation10 + $0xd8] sm:$0xff]   ;;  %p1762_p13 = scmp.lt.s32.totalorder %s2434_s20, %s1760_s6  ;;  %p1763_p10 = scmp.lt.s32.totalorder %s1761_s12, %s1755_s7 }
  0xd8   : > { %1396 = vmatprep.subr.bf16.mxu1 %v1594_v18  ;;  %v2381_v42 = vsel %vm405_vm11, 1.0, %v1928_v36  ;;  %v422_v47 = vmul.f32 %v2377_v40, %v419_v43  ;;  %p1757_p0 = pnand %p1756_p2, %p2586_p6 }
  0xd9   : > { %1321 = vmatpush3.bf16.msra.mxu0 %v1592_v15  ;;  %v423_v48 = vmul.f32 %v2381_v42, %v420_v44  ;;  %v424_v49 = vrot.slane %v421_v45, 7  ;;  %v435_v50 = vrot.slane %v421_v45, 1  ;;  %v1614_v15 = vld [vmem:[#allocation10 + $0x158] sm:$0xff]   ;;  %p1764_p7 = por %p1763_p10, %p1762_p13 }
  0xda   : > { %1322 = vmatprep.subr.bf16.mxu0 %v1593_v20  ;;  %v425_v52 = vrot.slane %v422_v47, 7  ;;  %v433_v53 = vpack.c.bf16 %v422_v47, %v421_v45  ;;  %v436_v55 = vrot.slane %v422_v47, 1  ;;  %v1619_v20 = vld [vmem:[#allocation10 + $0xe8] sm:$0xff]   ;;  %s2432_s2 = scalar_lea.hbm %s2585_s26, %s1309_s4  ;;  %p1758_p4 = pneg %p1757_p0 }
  0xdb   : > { %1397 = vmatpush3.bf16.msra.mxu1 %v1594_v18  ;;  %v426_v54 = vrot.slane %v423_v48, 7  ;;  %v437_v56 = vrot.slane %v423_v48, 1  ;;  %v434_v62 = vpack.c.bf16 %v423_v48, %v423_v48  ;;  %v1617_v18 = vld [vmem:[#allocation10 + $0x160] sm:$0xff]  }
  0xdc   : > { %1398 = vmatprep.subr.bf16.mxu1 %v1597_v25  ;;  %675 = vmatprep.mubr.bf16.mxu0 %v433_v53  ;;  %v429_v59 = vsel %vm427_vm12, %v424_v49, %v425_v52  ;;  %v440_v61 = vsel %vm438_vm13, %v435_v50, %v436_v55  ;;  %p1765_p12 = pnand %p1764_p7, %p1758_p4 }
  0xdd   : > { %1323 = vmatpush3.bf16.msra.mxu0 %v1595_v22  ;;  %v430_v60 = vsel %vm427_vm12, %v426_v54, %v424_v49  ;;  %v439_v0 = vsel %vm438_vm13, %v436_v55, %v437_v56  ;;  %v441_v1 = vsel %vm438_vm13, %v437_v56, %v435_v50  ;;  %v428_v4 = vsel %vm427_vm12, %v425_v52, %v426_v54  ;;  %v1621_v22 = vld [vmem:[#allocation10 + $0x130] sm:$0xff]  }
  0xde   : > { %1324 = vmatprep.subr.bf16.mxu0 %v1596_v27  ;;  %v431_v63 = vpack.c.bf16 %v429_v59, %v430_v60  ;;  %v442_v2 = vpack.c.bf16 %v439_v0, %v440_v61  ;;  %v443_v3 = vpack.c.bf16 %v441_v1, %v441_v1  ;;  %v432_v5 = vpack.c.bf16 %v428_v4, %v428_v4  ;;  %v1626_v27 = vld [vmem:[#allocation10 + $0x178] sm:$0xff]  }
  0xdf   : > { %1399 = vmatpush3.bf16.msra.mxu1 %v1597_v25  ;;  %v1624_v25 = vld [vmem:[#allocation10 + $0x138] sm:$0xff]  }
  0xe0   : > { %1400 = vmatprep.subr.bf16.mxu1 %v1600_v29  ;;  %1404 = vmatprep.mubr.bf16.mxu1 %v442_v2 }
  0xe1   : > { %1325 = vmatpush3.bf16.msra.mxu0 %v1598_v28 }
  0xe2   : > { %1326 = vmatprep.subr.bf16.mxu0 %v1599_v33  ;;  %v1256_v33 = vld [vmem:[%s2583_s30] ss:$0 sm:$0xff] }
  0xe3   : > { %1401 = vmatpush3.bf16.msra.mxu1 %v1600_v29 }
  0xe4   : > { %1402 = vmatprep.subr.bf16.mxu1 %v1602_v46 }
  0xe5   : > { %1327 = vmatpush3.bf16.msra.mxu0 %v1601_v35 }
  0xe6   : > { %1350 = vmatprep.subr.bf16.mxu0 %v1603_v51 }
  0xe7   : > { %1403 = vmatpush3.bf16.msra.mxu1 %v1602_v46 }
  0xe8   : > { %676 = vmatmul.mubr.bf16.vlgmr.msra.gmra.mrb[0].mxu0 %v431_v63  ;;  %1408 = vmatprep.subr.bf16.mxu1 %v1605_v58 }
  0xe9   : > { %683 = vmatprep.mubr.bf16.mxu0 %v434_v62  ;;  %1351 = vmatpush3.bf16.msra.mxu0 %v1604_v57 }
  0xea   : > { %1405 = vmatmul.mubr.bf16.vlgmr.msra.gmra.mrb[0].mxu1 %v443_v3  ;;  %1352 = vmatprep.subr.bf16.mxu0 %v1606_v6 }
  0xeb   : > { %1409 = vmatpush3.bf16.msra.mxu1 %v1605_v58 }
  0xec   : > { %1410 = vmatprep.subr.bf16.mxu1 %v1608_v8 }
  0xed   : > { %1353 = vmatpush3.bf16.msra.mxu0 %v1607_v7 }
  0xee   : > { %1354 = vmatprep.subr.bf16.mxu0 %v1609_v9 }
  0xef   : > { %1411 = vmatpush3.bf16.msra.mxu1 %v1608_v8 }
  0xf0   : > { %684 = vmatmul.mubr.bf16.gmra.mrb[4].mxu0 %v432_v5  ;;  %1412 = vmatprep.subr.bf16.mxu1 %v1611_v11 }
  0xf1   : > { %1355 = vmatpush3.bf16.msra.mxu0 %v1610_v10 }
  0xf2   : > { %1356 = vmatprep.subr.bf16.mxu0 %v1612_v13 }
  0xf3   : > { %1413 = vmatpush3.bf16.msra.mxu1 %v1611_v11 }
  0xf4   : > { %1414 = vmatprep.subr.bf16.mxu1 %v1614_v15 }
  0xf5   : > { %1357 = vmatpush3.bf16.msra.mxu0 %v1613_v14 }
  0xf6   : > { %1358 = vmatprep.subr.bf16.mxu0 %v1615_v16 }
  0xf7   : > { %1415 = vmatpush3.bf16.msra.mxu1 %v1614_v15 }
  0xf8   : > { %1416 = vmatprep.subr.bf16.mxu1 %v1617_v18 }
  0xf9   : > { %1359 = vmatpush3.bf16.msra.mxu0 %v1616_v17 }
  0xfa   : > { %1360 = vmatprep.subr.bf16.mxu0 %v1618_v19 }
  0xfb   : > { %1417 = vmatpush3.bf16.msra.mxu1 %v1617_v18 }
  0xfc   : > { %1418 = vmatprep.subr.bf16.mxu1 %v1620_v21 }
  0xfd   : > { %1361 = vmatpush3.bf16.msra.mxu0 %v1619_v20 }
  0xfe   : > { %1362 = vmatprep.subr.bf16.mxu0 %v1621_v22 }
  0xff   : > { %1419 = vmatpush3.bf16.msra.mxu1 %v1620_v21 }
 0x100   : > { %1420 = vmatprep.subr.bf16.mxu1 %v1623_v24 }
 0x101   : > { %1363 = vmatpush3.bf16.msra.mxu0 %v1622_v23 }
 0x102   : > { %1364 = vmatprep.subr.bf16.mxu0 %v1624_v25  ;;  %v1282_v25 = vld [vmem:[%s2583_s30 + $0x1] ss:$0 sm:$0xff] }
 0x103   : > { %1421 = vmatpush3.bf16.msra.mxu1 %v1623_v24 }
 0x104   : > { %1422 = vmatprep.subr.bf16.mxu1 %v1626_v27 }
 0x105   : > { %1365 = vmatpush3.bf16.msra.mxu0 %v1625_v26 }
 0x107   : > { %1423 = vmatpush3.bf16.msra.mxu1 %v1626_v27 }
 0x1bb   : > { %v1328_v28 = vpop.f32.mrb[0].mxu0 }
 0x1bc   : > { %v1329_v29 = vpop.f32.mrb[1].mxu0 }
 0x1bd   : > { %v1330_v34 = vadd.f32 %v1329_v29, %v1328_v28  ;;  %v1331_v35 = vpop.f32.mrb[2].mxu0  ;;  %v1406_v36 = vpop.f32.mrb[0].mxu1 }
 0x1be   : > { %v1332_v38 = vpop.f32.mrb[3].mxu0  ;;  %v725_v39 = vpop.f32.mrb[1].mxu1 }
 0x1bf   : > { %v1333_v41 = vadd.f32 %v1332_v38, %v1331_v35  ;;  %v678_v43 = vadd.f32 %v1330_v34, %v1256_v33  ;;  %v1407_v44 = vpop.f32.mrb[2].mxu1 }
 0x1c0   : > { %v728_v45 = vpop.f32.mrb[3].mxu1 }
 0x1c1   : > { %v726_v46 = vadd.f32 %v725_v39, %v678_v43  ;;  %v681_v47 = vadd.f32 %v1333_v41, %v1256_v33 }
 0x1c3   : > { %v739_v48 = vadd.f32 %v726_v46, %v2354_v30  ;;  %v729_v49 = vadd.f32 %v728_v45, %v681_v47  ;;  %v1334_v50 = vpop.f32.mrb[4].mxu0 }
 0x1c4   : > { %v1335_v51 = vpop.f32.mrb[5].mxu0 }
 0x1c5   : > { %vm742_vm14 = vcmp.gt.f32.partialorder %v739_v48, 0.0  ;;  %v745_v52 = vmul.f32 0.1, %v739_v48  ;;  %v740_v53 = vadd.f32 %v729_v49, %v2358_v31  ;;  %v1336_v54 = vadd.f32 %v1335_v51, %v1334_v50  ;;  %v1337_v55 = vpop.f32.mrb[6].mxu0 }
 0x1c6   : > { %v1338_v56 = vpop.f32.mrb[7].mxu0 }
 0x1c7   : > { %v748_v57 = vsel %vm742_vm14, %v739_v48, %v745_v52  ;;  %vm743_vm15 = vcmp.gt.f32.partialorder %v740_v53, 0.0  ;;  %v746_v58 = vmul.f32 0.1, %v740_v53  ;;  %v686_v59 = vadd.f32 %v1336_v54, %v1256_v33 }
 0x1c8   : > { %v751_v62 = vmul.f32 %v2371_v37, %v748_v57 }
 0x1c9   : > { %v734_v60 = vadd.f32 %v1406_v36, %v686_v59  ;;  %v749_v61 = vsel %vm743_vm15, %v740_v53, %v746_v58 }
 0x1ca   : > { %v752_v30 = vmul.f32 %v2377_v40, %v749_v61  ;;  %v754_v5 = vrot.slane %v751_v62, 5  ;;  %v765_v37 = vrot.slane %v751_v62, 3 }
 0x1cb   : > { %v741_v63 = vadd.f32 %v734_v60, %v2362_v32 }
 0x1cc   : > { %v763_v0 = vpack.c.bf16 %v752_v30, %v751_v62  ;;  %v755_v2 = vrot.slane %v752_v30, 5  ;;  %v766_v4 = vrot.slane %v752_v30, 3 }
 0x1cd   : > { %vm744_vm0 = vcmp.gt.f32.partialorder %v741_v63, 0.0  ;;  %v747_v1 = vmul.f32 0.1, %v741_v63 }
 0x1ce   : > { %1007 = vmatprep.mubr.bf16.mxu0 %v763_v0  ;;  %v759_v32 = vsel %vm757_vm1, %v754_v5, %v755_v2  ;;  %v770_v10 = vsel %vm768_vm2, %v765_v37, %v766_v4 }
 0x1cf   : > { %v750_v31 = vsel %vm744_vm0, %v741_v63, %v747_v1 }
 0x1d0   : > { %v753_v3 = vmul.f32 %v2381_v42, %v750_v31 }
 0x1d2   : > { %v756_v6 = vrot.slane %v753_v3, 5  ;;  %v767_v7 = vrot.slane %v753_v3, 3  ;;  %v764_v15 = vpack.c.bf16 %v753_v3, %v753_v3 }
 0x1d4   : > { %v760_v8 = vsel %vm757_vm1, %v756_v6, %v754_v5  ;;  %v769_v9 = vsel %vm768_vm2, %v766_v4, %v767_v7  ;;  %v771_v11 = vsel %vm768_vm2, %v767_v7, %v765_v37  ;;  %v758_v16 = vsel %vm757_vm1, %v755_v2, %v756_v6 }
 0x1d5   : > { %v761_v13 = vpack.c.bf16 %v759_v32, %v760_v8  ;;  %v772_v42 = vpack.c.bf16 %v769_v9, %v770_v10  ;;  %v773_v14 = vpack.c.bf16 %v771_v11, %v771_v11  ;;  %v762_v17 = vpack.c.bf16 %v758_v16, %v758_v16 }
 0x1d7   : > { %1008 = vmatmul.mubr.bf16.vlgmr.msra.gmra.mrb[8].mxu0 %v761_v13  ;;  %1424 = vmatprep.mubr.bf16.mxu1 %v772_v42 }
 0x1d8   : > { %1014 = vmatprep.mubr.bf16.mxu0 %v764_v15  ;;  %1425 = vmatmul.mubr.bf16.vlgmr.msra.gmra.mrb[4].mxu1 %v773_v14 }
 0x1df   : > { %1015 = vmatmul.mubr.bf16.gmra.mrb[12].mxu0 %v762_v17 }
 0x2aa   : > { %v1366_v18 = vpop.f32.mrb[8].mxu0 }
 0x2ab   : > { %v1367_v19 = vpop.f32.mrb[9].mxu0  ;;  %v1426_v20 = vpop.f32.mrb[4].mxu1 }
 0x2ac   : > { %v1369_v21 = vpop.f32.mrb[10].mxu0  ;;  %v1055_v22 = vpop.f32.mrb[5].mxu1 }
 0x2ad   : > { %v1370_v23 = vpop.f32.mrb[11].mxu0  ;;  %v1427_v24 = vpop.f32.mrb[6].mxu1 }
 0x2ae   : > { %v1371_v26 = vadd.f32 %v1370_v23, %v1369_v21  ;;  %v1057_v27 = vpop.f32.mrb[7].mxu1 }
 0x2b0   : > { %v1012_v12 = vadd.f32 %v1371_v26, %v1282_v25 }
 0x2b2   : > { %v1058_v28 = vadd.f32 %v1057_v27, %v1012_v12  ;;  %v1372_v29 = vpop.f32.mrb[12].mxu0 }
 0x2b3   : > { %v1373_v33 = vpop.f32.mrb[13].mxu0 }
 0x2b4   : > { %v1067_v34 = vadd.f32 %v1058_v28, %v740_v53  ;;  %v1375_v35 = vpop.f32.mrb[14].mxu0 }
 0x2b5   : > { %v1376_v36 = vpop.f32.mrb[15].mxu0 }
 0x2b6   : > { %v1068_v38 = vmul.f32 %v2377_v40, %v1067_v34 }
 0x2b8   : > { %1069 = vst [vmem:[%s374_s22] sm:$0xff] %v1068_v38 }
 0x2b9   : > { %1768 = shalt.err (!%p1765_p12)
}
 0x2ba   : > { %s1769_s25 = scalar_lea.hbm %s2432_s2, 128  ;;  %s1773_s4 = scalar_lea.hbm %s2585_s26, 512 }
 0x2bb   : > { %p1770_p11 = scmp.ne.s32.totalorder %s2432_s2, %s1769_s25  ;;  %p1774_p8 = scmp.lt.u32.totalorder %s2432_s2, %s2585_s26 }
 0x2bc   : > { %p1775_p5 = scmp.lt.u32.totalorder %s1773_s4, %s1769_s25  ;;  %p1777_p2 = scmp.lt.u32.totalorder %s1769_s25, %s2432_s2 }
 0x2bd   : > { %p1771_p1 = pnand %p1770_p11, %p2586_p6 }
 0x2be   : > { %p1776_p3 = por %p1775_p5, %p1774_p8 }
 0x2bf   : > { %p1772_p9 = pneg %p1771_p1 }
 0x2c0   : > { %p1778_p0 = por %p1777_p2, %p1776_p3 }
 0x2c2   : > { %p1779_p4 = pnand %p1778_p0, %p1772_p9 }
 0x2c4   : > { %1782 = shalt.err (!%p1779_p4)
}
 0x2c5   : > { %1438 = dma.vmem_to_hbm [thread:$0]  (%p2586_p6), %s2434_s20, 128, %s2432_s2, %s1071_s23  }
 0x2c6 PF: > { %s2587_s28 = sld [smem:[#allocation19_spill]]  ;;  %s2588_s7 = sld [smem:[#allocation25_spill]] }
 0x2c7   : > { %p1461_p13 = scmp.ge.s32.totalorder %s1919_s19, 2 }
 0x2cc   : > { %s1098_s29 = sand.u32 1, %s2587_s28   ;;  %p2589_p10 = scmp.ne.s32.totalorder %s2588_s7, 0 }
 0x2cd   : > { %s1099_s6 = scalar_lea.sflag [#allocation6], %s1098_s29 }
 0x2ce   : > { %p1455_p7 = pnand %p1461_p13, %p2589_p10 }
 0x2d0   : > { %1858 = dma.done.wait (!%p1455_p7), %s1099_s6, 128  }
 0x2d1   : > { %1860 = vsyncadd (!%p1455_p7), %s1099_s6, 4294967168  ;;  %s30_s19 = sadd.s32 1, %s1919_s19   ;;  %s2591_s20 = sld [smem:[#allocation22_spill]] }
 0x2d2   : > { %p2464_p12 = scmp.ge.s32.totalorder %s30_s19, 6   ;;  %s2592_s2 = sld [smem:[#allocation26_spill]] }
 0x2d3   : > { %s2594_s7 = smov %s1871_s8  ;;  %s2595_s8 = smov %s1875_s9 }
 0x2d4   : > { %s2596_s9 = smov %s2271_s15  ;;  %s2597_s10 = smov %s1883_s11 }
 0x2d5   : > { %s2598_s11 = smov %s1887_s0  ;;  %s2599_s0 = smov %s2207_s27 }
 0x2d6   : > { %s2600_s12 = smov %s1895_s13  ;;  %s2601_s13 = smov %s1899_s14 }
 0x2d7   : > { %s2602_s14 = smov %s2202_s5  ;;  %s2603_s15 = smov %s1911_s17 }
 0x2d8   : > { %s2604_s16 = smov %s1915_s18  ;;  %s2605_s17 = smov %s2591_s20 }
 0x2d9   : > { %s2606_s18 = smov %s2592_s2  ;;  %29 = sbr.rel (!%p2464_p12) target bundleno = 26 (0x1a), region = 115 }
 0x2e0   :  { %1104 = vsyncpa [#allocation5], 1 }
 0x2e1   :  { %1106 = vsyncpa [#allocation5 + $0x1], 1 }
 0x2e2   :  { %1107 = vsyncpa [#allocation8], 1 }
 0x2e3   :  { %1109 = vsyncpa [#allocation8 + $0x1], 1 }
 0x2e4   :  { %1110 = vsyncpa [#allocation11], 1 }
 0x2e5   :  { %1111 = vsyncpa [#allocation6], 1 }
 0x2e6   :  { %1113 = vsyncpa [#allocation6 + $0x1], 1 }

// kernel: tpu_custom_call.1
= control target key start
LH: loop header
LB: loop body
LE: loop exit
PB: predicated region body
PF: predicated region fallthrough
CT: control target
= control target key end

     0   :  { %s2511_s0 = inlined_call_operand.hbm [shape: s32[2], index: 0, kind: input, shape index: {}]   ;;  %s2512_s1 = inlined_call_operand.hbm [shape: f32[2,16,128], index: 1, kind: input, shape index: {}]   ;;  %s2513_s2 = inlined_call_operand.hbm [shape: f32[2,16,128], index: 2, kind: input, shape index: {}]   ;;  %s2514_s3 = inlined_call_operand.hbm [shape: f32[2,16,128], index: 3, kind: input, shape index: {}]   ;;  %s2515_s4 = inlined_call_operand.hbm [shape: bf16[2,384,128], index: 4, kind: input, shape index: {}]   ;;  %s2516_s5 = inlined_call_operand.vmem [shape: f32[2,1,128], index: 5, kind: input, shape index: {}]   ;;  %s2517_s6 = inlined_call_operand.hbm [shape: f32[2,16,128], index: 6, kind: output, shape index: {}]  }
   0x1   :  { %2538 = sst [smem:[#allocation27_spill]] %s2513_s2  ;;  %s1627_s23 = scalar_lea.hbm %s2511_s0, 16 }
   0x2   :  { %2539 = sst [smem:[#allocation28_spill]] %s2515_s4  ;;  %p1628_p0 = scmp.ne.s32.totalorder %s2511_s0, %s1627_s23 }
   0x3   :  { %2540 = sst [smem:[#allocation29_spill]] %s2516_s5  ;;  %p1631_p1 = scmp.lt.u32.totalorder %s1627_s23, %s2511_s0 }
   0x4   :  { %2541 = sst [smem:[#allocation30_spill]] %s2517_s6 }
   0x5   :  { %p1633_p2 = pnand %p1631_p1, %p1628_p0 }
   0x7   :  { %1636 = shalt.err (!%p1633_p2)  }
   0x8   :  { %s1921_s28 = smov [#allocation3]  }
   0x9   :  { %12 = dma.hbm_to_smem %s2511_s0, 16, %s1921_s28, [#allocation2] }
   0xa   :  { %1839 = dma.done.wait [#allocation2], 16 }
   0xb   :  { %1840 = vsyncadd [#allocation2], 4294967280 }
   0xc   :  { %14 = sfence }
   0xd   :  { %15 = vsyncpa [#allocation5], 0 }
   0xe   :  { %17 = vsyncpa [#allocation5 + $0x1], 0 }
   0xf   :  { %18 = vsyncpa [#allocation8], 0 }
  0x10   :  { %20 = vsyncpa [#allocation8 + $0x1], 0 }
  0x11   :  { %21 = vsyncpa [#allocation11], 0 }
  0x12   :  { %22 = vsyncpa [#allocation6], 0 }
  0x13   :  { %24 = vsyncpa [#allocation6 + $0x1], 0  ;;  %s1977_s7 = smov 0   ;;  %s1979_s8 = smov 0  }
  0x14   :  { %s1981_s9 = smov 0   ;;  %s1983_s10 = smov 0  }
  0x15   :  { %s1985_s11 = smov 0   ;;  %s1987_s0 = smov 0  }
  0x16   :  { %s1989_s12 = smov 0   ;;  %s1991_s13 = smov 0  }
  0x17   :  { %s1993_s14 = smov 0   ;;  %s1995_s15 = smov 0  }
  0x18   :  { %s1997_s16 = smov 0   ;;  %s1999_s17 = smov 0  }
  0x19   :  { %s2001_s18 = smov 0   ;;  %s2003_s19 = smov 0  }
  0x1a LB: > { %2542 = sst [smem:[#allocation19_spill]] %s1879_s10  ;;  %s2048_s20 = sadd.s32 4294967295, %s1919_s19   ;;  %s1919_s19 = sphi %s2003_s19, %s30_s19   ;;  %s1915_s18 = sphi %s2001_s18, %s2606_s18   ;;  %s1911_s17 = sphi %s1999_s17, %s2605_s17   ;;  %s1907_s16 = sphi %s1997_s16, %s2604_s16   ;;  %s1903_s15 = sphi %s1995_s15, %s2603_s15   ;;  %s1899_s14 = sphi %s1993_s14, %s2602_s14   ;;  %s1895_s13 = sphi %s1991_s13, %s2601_s13   ;;  %s1891_s12 = sphi %s1989_s12, %s2600_s12   ;;  %s1887_s0 = sphi %s1987_s0, %s2599_s0   ;;  %s1883_s11 = sphi %s1985_s11, %s2598_s11   ;;  %s1879_s10 = sphi %s1983_s10, %s2597_s10   ;;  %s1875_s9 = sphi %s1981_s9, %s2596_s9   ;;  %s1871_s8 = sphi %s1979_s8, %s2595_s8   ;;  %s1867_s7 = sphi %s1977_s7, %s2594_s7  }
  0x1b   : > { %2543 = sst [smem:[#allocation20_spill]] %s1903_s15  ;;  %s1229_s21 = sadd.s32 4294967294, %s1919_s19  }
  0x1c   : > { %2544 = sst [smem:[#allocation21_spill]] %s1907_s16  ;;  %s39_s22 = sadd.s32 1, %s1911_s17 }
  0x1d   : > { %s42_s23 = sadd.s32 1, %s1915_s18  ;;  %p40_p3 = scmp.ge.s32.totalorder %s39_s22, 2 }
  0x1e   : > { %p2529_p4 = scmp.eq.s32.totalorder %s1919_s19, 0  ;;  %p2530_p5 = scmp.eq.s32.totalorder %s2048_s20, 0 }
  0x1f   : > { %s2608_s22 = smov (%p40_p3, %s39_s22), 0  ;;  %s2610_s23 = smov (!%p40_p3, %s42_s23), %s1915_s18 }
  0x20   : > { %2545 = sst [smem:[#allocation22_spill]] %s2608_s22  ;;  %p92_p6 = scmp.ne.s32.totalorder %s1887_s0, %s1883_s11 }
  0x21   : > { %p98_p7 = scmp.ne.s32.totalorder %s1883_s11, %s1879_s10  ;;  %p200_p8 = scmp.eq.s32.totalorder %s2048_s20, 3 }
  0x22   : > { %p2070_p9 = por %p92_p6, %p2529_p4  ;;  %p206_p10 = scmp.eq.s32.totalorder %s1229_s21, 3 }
  0x23   : > { %p2076_p11 = por %p98_p7, %p2530_p5  ;;  %p2080_p12 = por %p200_p8, %p92_p6 }
  0x24   : > { %p2084_p13 = por %p206_p10, %p98_p7  ;;  %p2528_p0 = scmp.lt.s32.totalorder %s1919_s19, 4 }
  0x25   : > { %s2547_s27 = scalar_select %p2076_p11, 1, 0 }
  0x26   : > { %s2549_s28 = scalar_select %p2080_p12, 1, 0 }
  0x27   : > { %2548 = sst [smem:[#allocation23_spill]] %s2547_s27  ;;  %s1237_s30 = sshll.u32 %s1915_s18, 1 }
  0x28   : > { %2550 = sst [smem:[#allocation24_spill]] %s2549_s28  ;;  %s265_s24 = sand.u32 1, %s1919_s19  }
  0x29   : > { %s2551_s29 = scalar_select %p2084_p13, 1, 0 }
  0x2a   : > { %s267_s25 = sand.u32 1, %s1887_s0   ;;  %s274_s6 = sadd.s32 %s1911_s17, %s1237_s30 }
  0x2b   : > { %2552 = sst [smem:[#allocation25_spill]] %s2551_s29  ;;  %s1239_s10 = sshll.u32 %s267_s25, 3 }
  0x2c   : > { %s1241_s21 = sshll.u32 %s274_s6, 7  ;;  %s2553_s2 = sld [smem:[#allocation27_spill]] }
  0x2d   : > { %s269_s28 = scalar_lea.vmem [#allocation7], %s1239_s10  ;;  %p2104_p1 = pnand %p2528_p0, %p2070_p9 }
  0x2e   : > { %s278_s27 = sshll.u32 %s269_s28, 4  ;;  %s2108_s6 = scalar_lea.sflag [#allocation8], %s265_s24  ;;  %s2098_s27 = int_to_ptr.vmem [resolvable:$true] %s278_s27 }
  0x2f   : > { %p1639_p3 = pneg %p2104_p1 }
  0x32   : > { %s2096_s15 = scalar_lea.hbm %s2553_s2, %s1241_s21  ;;  %s1642_s25 = scalar_lea.hbm %s2553_s2, 512 }
  0x33   : > { %s1637_s5 = scalar_lea.hbm %s2096_s15, 128  ;;  %p1643_p8 = scmp.lt.u32.totalorder %s2096_s15, %s2553_s2 }
  0x34   : > { %p1638_p2 = scmp.ne.s32.totalorder %s2096_s15, %s1637_s5  ;;  %p1644_p9 = scmp.lt.u32.totalorder %s1642_s25, %s1637_s5 }
  0x35   : > { %p1646_p0 = scmp.lt.u32.totalorder %s1637_s5, %s2096_s15 }
  0x36   : > { %p1640_p6 = pnand %p1639_p3, %p1638_p2  ;;  %p1645_p10 = por %p1644_p9, %p1643_p8 }
  0x38   : > { %p1641_p7 = pneg %p1640_p6  ;;  %p1647_p4 = por %p1646_p0, %p1645_p10 }
  0x3a   : > { %p1648_p5 = pnand %p1647_p4, %p1641_p7 }
  0x3c   : > { %1651 = shalt.err (!%p1648_p5)
}
  0x3d   : > { %s1652_s24 = scalar_lea.vmem %s2098_s27, 128  ;;  %s1922_s30 = smov [#allocation7]  }
  0x3e   : > { %p1653_p2 = scmp.ne.s32.totalorder %s2098_s27, %s1652_s24  ;;  %s1657_s21 = sshll.u32 %s1922_s30, 4  ;;  %s1658_s21 = int_to_ptr.vmem [resolvable:$false] %s1657_s21 }
  0x3f   : > { %s1659_s10 = scalar_lea.vmem %s1658_s21, 256  ;;  %p1660_p12 = scmp.lt.s32.totalorder %s2098_s27, %s1658_s21 }
  0x40   : > { %p1655_p6 = pnand %p1653_p2, %p1639_p3  ;;  %p1661_p8 = scmp.lt.s32.totalorder %s1659_s10, %s1652_s24 }
  0x42   : > { %p1656_p13 = pneg %p1655_p6  ;;  %p1662_p9 = por %p1661_p8, %p1660_p12 }
  0x44   : > { %p1663_p0 = pnand %p1662_p9, %p1656_p13 }
  0x46   : > { %1666 = shalt.err (!%p1663_p0)
}
  0x47   : > { %1450 = dma.hbm_to_vmem [thread:$0]  (!%p2104_p1), %s2096_s15, 128, %s2098_s27, %s2108_s6  }
  0x48   : > { %p1232_p4 = scmp.ge.s32.totalorder %s1919_s19, 1  ;;  %p213_p5 = scmp.lt.s32.totalorder %s1919_s19, 5 }
  0x49   : > { %s1923_s5 = smov [#allocation10]   ;;  %p2556_p13 = scmp.eq.s32.totalorder %s2048_s20, 0 }
  0x4a   : > { %s225_s16 = sshll.u32 %s1923_s5, 4  ;;  %p2138_p3 = pnand %p1232_p4, %p213_p5  ;;  %s226_s16 = int_to_ptr.vmem [resolvable:$true] %s225_s16 }
  0x4b   : > { %s2558_s4 = sld [smem:[#allocation28_spill]] }
  0x4c   : > { %s2555_s25 = scalar_select %p2138_p3, 1, 0 }
  0x4d   : > { %p1440_p12 = pneg %p2138_p3 }
  0x4f   : > { %p2146_p7 = pnand %p1440_p12, %p2556_p13 }
  0x51   : > { %s1667_s26 = scalar_lea.hbm %s2558_s4, 6144  ;;  %p1669_p2 = pneg %p2146_p7 }
  0x52   : > { %p1668_p1 = scmp.ne.s32.totalorder %s2558_s4, %s1667_s26  ;;  %p1674_p9 = scmp.lt.u32.totalorder %s1667_s26, %s2558_s4 }
  0x54   : > { %p1670_p6 = pnand %p1669_p2, %p1668_p1 }
  0x56   : > { %p1671_p8 = pneg %p1670_p6 }
  0x58   : > { %p1676_p0 = pnand %p1674_p9, %p1671_p8 }
  0x5a   : > { %1679 = shalt.err (!%p1676_p0)
}
  0x5b   : > { %s1680_s10 = scalar_lea.vmem %s226_s16, 6144  ;;  %p1688_p13 = scmp.lt.s32.totalorder %s226_s16, %s226_s16 }
  0x5c   : > { %p1681_p4 = scmp.ne.s32.totalorder %s226_s16, %s1680_s10  ;;  %p1689_p10 = scmp.lt.s32.totalorder %s1680_s10, %s1680_s10 }
  0x5e   : > { %p1683_p5 = pnand %p1681_p4, %p1669_p2  ;;  %p1690_p11 = por %p1689_p10, %p1688_p13 }
  0x60   : > { %p1684_p12 = pneg %p1683_p5 }
  0x62   : > { %p1691_p3 = pnand %p1690_p11, %p1684_p12 }
  0x64   : > { %1694 = shalt.err (!%p1691_p3)
}
  0x65   : > { %s1924_s5 = smov 64   ;;  %s1925_s15 = smov 4  }
  0x66   : > { %1443 = dma.hbm_to_vmem [thread:$0]  (!%p2146_p7), %s2558_s4, 6144, %s226_s16, [#allocation11], %s1924_s5, %s1924_s5, %s1925_s15  }
  0x67   : > { %p2559_p11 = scmp.ge.s32.totalorder %s2610_s23, 2  ;;  %s57_s24 = sadd.s32 1, %s1899_s14 }
  0x68   : > { %p64_p3 = scmp.ne.s32.totalorder %s1899_s14, %s1895_s13  ;;  %p70_p10 = scmp.ne.s32.totalorder %s1895_s13, %s1891_s12 }
  0x69   : > { %s2612_s23 = smov (%p2559_p11, %s2610_s23), 0  ;;  %p2561_p1 = scmp.eq.s32.totalorder %s1919_s19, 0 }
  0x6a   : > { %2560 = sst [smem:[#allocation26_spill]] %s2612_s23  ;;  %s2174_s28 = ssub.s32 %s1915_s18, %s2612_s23 }
  0x6b   : > { %p2183_p2 = por %p2561_p1, %p64_p3  ;;  %p2536_p7 = scmp.eq.s32.totalorder %s2174_s28, 0 }
  0x6c   : > { %p2563_p6 = scmp.eq.s32.totalorder %s2048_s20, 0  ;;  %s2565_s30 = ssub.s32 %s1911_s17, %s2608_s22 }
  0x6d   : > { %s82_s21 = sor.u32 %s2565_s30, %s2174_s28  ;;  %s242_s10 = sand.u32 1, %s1899_s14  }
  0x6e   : > { %p2190_p8 = por %p2563_p6, %p70_p10  ;;  %p83_p9 = scmp.eq.s32.totalorder %s82_s21, 0 }
  0x6f   : > { %s2202_s5 = scalar_select %p2536_p7, %s1899_s14, %s57_s24  }
  0x70   : > { %s1235_s12 = sshll.u32 %s242_s10, 3  ;;  %s2566_s15 = sadd.s32 1, %s1887_s0 }
  0x71   : > { %s2207_s27 = scalar_select %p83_p9, %s1887_s0, %s2566_s15  }
  0x72   : > { %s1861_s26 = sshll.u32 %s1915_s18, 8  ;;  %s246_s30 = scalar_lea.vmem [#allocation4], %s1235_s12 }
  0x73   : > { %s2215_s23 = scalar_lea.hbm %s2512_s1, %s1861_s26  ;;  %s258_s22 = sshll.u32 %s246_s30, 4  ;;  %s2217_s22 = int_to_ptr.vmem [resolvable:$true] %s258_s22 }
  0x74   : > { %p2567_p0 = scmp.lt.s32.totalorder %s1919_s19, 4  ;;  %s243_s21 = scalar_lea.sflag [#allocation5], %s242_s10 }
  0x75   : > { %s1695_s2 = scalar_lea.hbm %s2215_s23, 128  ;;  %s1700_s29 = scalar_lea.hbm %s2512_s1, 512 }
  0x76   : > { %p2223_p4 = pnand %p2567_p0, %p2183_p2  ;;  %p1696_p5 = scmp.ne.s32.totalorder %s2215_s23, %s1695_s2 }
  0x77   : > { %p1701_p3 = scmp.lt.u32.totalorder %s2215_s23, %s2512_s1  ;;  %p1702_p10 = scmp.lt.u32.totalorder %s1700_s29, %s1695_s2 }
  0x78   : > { %p1697_p12 = pneg %p2223_p4  ;;  %p1704_p2 = scmp.lt.u32.totalorder %s1695_s2, %s2215_s23 }
  0x79   : > { %p1703_p1 = por %p1702_p10, %p1701_p3 }
  0x7a   : > { %p1698_p13 = pnand %p1697_p12, %p1696_p5 }
  0x7b   : > { %p1705_p6 = por %p1704_p2, %p1703_p1 }
  0x7c   : > { %p1699_p11 = pneg %p1698_p13 }
  0x7e   : > { %p1706_p9 = pnand %p1705_p6, %p1699_p11 }
  0x80   : > { %1709 = shalt.err (!%p1706_p9)
}
  0x81   : > { %s1710_s10 = scalar_lea.vmem %s2217_s22, 128  ;;  %s1926_s4 = smov [#allocation4]  }
  0x82   : > { %p1711_p0 = scmp.ne.s32.totalorder %s2217_s22, %s1710_s10  ;;  %s1715_s12 = sshll.u32 %s1926_s4, 4  ;;  %s1716_s12 = int_to_ptr.vmem [resolvable:$false] %s1715_s12 }
  0x83   : > { %s1717_s15 = scalar_lea.vmem %s1716_s12, 256  ;;  %p1718_p7 = scmp.lt.s32.totalorder %s2217_s22, %s1716_s12 }
  0x84   : > { %p1713_p5 = pnand %p1711_p0, %p1697_p12  ;;  %p1719_p3 = scmp.lt.s32.totalorder %s1717_s15, %s1710_s10 }
  0x86   : > { %p1714_p13 = pneg %p1713_p5  ;;  %p1720_p10 = por %p1719_p3, %p1718_p7 }
  0x88   : > { %p1721_p1 = pnand %p1720_p10, %p1714_p13 }
  0x8a   : > { %1724 = shalt.err (!%p1721_p1)
}
  0x8b   : > { %1447 = dma.hbm_to_vmem [thread:$0]  (!%p2223_p4), %s2215_s23, 128, %s2217_s22, %s243_s21  }
  0x8c   : > { %s119_s2 = sadd.s32 1, %s1875_s9  ;;  %p126_p7 = scmp.ne.s32.totalorder %s1875_s9, %s1871_s8 }
  0x8d   : > { %p132_p12 = scmp.ne.s32.totalorder %s1871_s8, %s1867_s7  ;;  %s287_s29 = sand.u32 1, %s1875_s9  }
  0x8e   : > { %p2569_p11 = scmp.eq.s32.totalorder %s1919_s19, 0  ;;  %p2570_p6 = scmp.eq.s32.totalorder %s2048_s20, 0 }
  0x8f   : > { %s1242_s30 = sshll.u32 %s287_s29, 3  ;;  %s1863_s10 = sadd.s32 128, %s1861_s26 }
  0x90   : > { %p128_p2 = por %p126_p7, %p2569_p11  ;;  %p2262_p9 = por %p132_p12, %p2570_p6 }
  0x91   : > { %s289_s4 = scalar_lea.vmem [#allocation9], %s1242_s30  ;;  %p2572_p0 = scmp.eq.s32.totalorder %s2174_s28, 0 }
  0x92   : > { %s2571_s24 = scalar_select %p2262_p9, 1, 0 }
  0x93   : > { %s301_s12 = sshll.u32 %s289_s4, 4  ;;  %s2276_s7 = scalar_lea.hbm %s2514_s3, %s1863_s10  ;;  %s2278_s12 = int_to_ptr.vmem [resolvable:$true] %s301_s12 }
  0x94   : > { %s2271_s15 = scalar_select %p2572_p0, %s1875_s9, %s119_s2  }
  0x95   : > { %p2573_p4 = scmp.lt.s32.totalorder %s1919_s19, 4  ;;  %s1725_s28 = scalar_lea.hbm %s2276_s7, 128 }
  0x96   : > { %p1726_p13 = scmp.ne.s32.totalorder %s2276_s7, %s1725_s28  ;;  %s1730_s29 = scalar_lea.hbm %s2514_s3, 512 }
  0x97   : > { %p2282_p5 = pnand %p2573_p4, %p128_p2  ;;  %p1731_p7 = scmp.lt.u32.totalorder %s2276_s7, %s2514_s3 }
  0x98   : > { %p1732_p12 = scmp.lt.u32.totalorder %s1730_s29, %s1725_s28  ;;  %p1734_p2 = scmp.lt.u32.totalorder %s1725_s28, %s2276_s7 }
  0x99   : > { %p1727_p3 = pneg %p2282_p5 }
  0x9a   : > { %p1733_p11 = por %p1732_p12, %p1731_p7 }
  0x9b   : > { %p1728_p10 = pnand %p1727_p3, %p1726_p13 }
  0x9c   : > { %p1735_p6 = por %p1734_p2, %p1733_p11 }
  0x9d   : > { %p1729_p1 = pneg %p1728_p10 }
  0x9f   : > { %p1736_p0 = pnand %p1735_p6, %p1729_p1 }
  0xa1   : > { %1739 = shalt.err (!%p1736_p0)
}
  0xa2   : > { %s1740_s4 = scalar_lea.vmem %s2278_s12, 128  ;;  %s1927_s22 = smov [#allocation9]  }
  0xa3   : > { %p1741_p4 = scmp.ne.s32.totalorder %s2278_s12, %s1740_s4  ;;  %s1745_s23 = sshll.u32 %s1927_s22, 4  ;;  %s1746_s23 = int_to_ptr.vmem [resolvable:$false] %s1745_s23 }
  0xa4   : > { %s1747_s26 = scalar_lea.vmem %s1746_s23, 256  ;;  %p1748_p9 = scmp.lt.s32.totalorder %s2278_s12, %s1746_s23 }
  0xa5   : > { %p1743_p13 = pnand %p1741_p4, %p1727_p3  ;;  %p1749_p7 = scmp.lt.s32.totalorder %s1747_s26, %s1740_s4 }
  0xa7   : > { %p1744_p10 = pneg %p1743_p13  ;;  %p1750_p12 = por %p1749_p7, %p1748_p9 }
  0xa9   : > { %p1751_p11 = pnand %p1750_p12, %p1744_p10 }
  0xab   : > { %1754 = shalt.err (!%p1751_p11)
}
  0xac   : > { %1453 = dma.hbm_to_vmem [thread:$0]  (!%p2282_p5), %s2276_s7, 128, %s2278_s12, %s2108_s6  }
  0xad   : > { %p2575_p1 = scmp.ne.s32.totalorder %s2555_s25, 0 }
  0xae   : > { %s312_s28 = sand.u32 (!%p2575_p1), 1, %s1895_s13  }
  0xaf   : > { %310 = sbr.rel (%p2575_p1) target bundleno = 710 (0x2c6), region = 40  ;;  %s2315_s2 = sshll.u32 (!%p2575_p1), %s312_s28, 3 }
  0xb0   : > { %s313_s29 = scalar_lea.sflag (!%p2575_p1), [#allocation5], %s312_s28  ;;  %s316_s30 = scalar_lea.vmem (!%p2575_p1), [#allocation4], %s2315_s2 }
  0xb6   : > { %1842 = dma.done.wait (%p2190_p8), %s313_s29, 128  }
  0xb7   : > { %1844 = vsyncadd (%p2190_p8), %s313_s29, 4294967168  ;;  %s2576_s6 = sld [smem:[#allocation23_spill]]  ;;  %s321_s12 = sand.u32 1, %s2048_s20  }
  0xb8   : > { %s323_s25 = sand.u32 1, %s1883_s11   ;;  %s322_s21 = scalar_lea.sflag [#allocation8], %s321_s12 }
  0xb9   : > { %s2326_s7 = sshll.u32 %s323_s25, 3 }
  0xba   : > { %s325_s10 = scalar_lea.vmem [#allocation7], %s2326_s7 }
  0xbd   : > { %p2577_p9 = scmp.ne.s32.totalorder %s2576_s6, 0 }
  0xbf   : > { %1846 = dma.done.wait (%p2577_p9), %s322_s21, 128  }
  0xc0   : > { %1848 = vsyncadd (%p2577_p9), %s322_s21, 4294967168  ;;  %s332_s16 = sand.u32 1, %s1871_s8   ;;  %p2578_p8 = scmp.ne.s32.totalorder %s2571_s24, 0 }
  0xc1   : > { %s2334_s4 = sshll.u32 %s332_s16, 3 }
  0xc2   : > { %s334_s22 = scalar_lea.vmem [#allocation9], %s2334_s4 }
  0xc3   : > { %1850 = dma.done.wait (%p2578_p8), %s322_s21, 128  }
  0xc4   : > { %1852 = vsyncadd (%p2578_p8), %s322_s21, 4294967168  ;;  %p2579_p5 = scmp.eq.s32.totalorder %s2048_s20, 0 }
  0xc6   : > { %1854 = dma.done.wait (%p2579_p5), [#allocation11], 6144   ;;  %p2580_p3 = pmov %p2579_p5 }
  0xc7   : > { %v1579_v0 = vld [vmem:[#allocation10 + $0x40] sm:$0xff]   ;;  %s2581_s23 = sld [smem:[#allocation20_spill]]  ;;  %v1581_v2 = vld [vmem:[#allocation10 + $0x48] sm:$0xff]   ;;  %s2582_s26 = sld [smem:[#allocation21_spill]]  ;;  %v1584_v5 = vld [vmem:[#allocation10 + $0x50] sm:$0xff]   ;;  %v386_v7 = vlaneseq  ;;  %v1928_v36 = vmov 0.0  }
  0xc8   : > { %1856 = vsyncadd (%p2580_p3), [#allocation11], 4294961152  ;;  %v1580_v1 = vld [vmem:[#allocation10] sm:$0xff]   ;;  %1312 = vmatprep.subr.bf16.mxu0 %v1579_v0  ;;  %v1583_v4 = vld [vmem:[#allocation10 + $0x8] sm:$0xff]   ;;  %s2584_s16 = sld [smem:[#allocation24_spill]]  ;;  %s1929_s29 = smov [#allocation12]  }
  0xc9   : > { %1313 = vmatpush3.bf16.msra.mxu0 %v1580_v1  ;;  %v1582_v3 = vld [vmem:[#allocation10 + $0x80] sm:$0xff]   ;;  %v1585_v6 = vld [vmem:[#allocation10 + $0x88] sm:$0xff]   ;;  %v1586_v8 = vld [vmem:[#allocation10 + $0x10] sm:$0xff]   ;;  %v2347_v12 = vshrl.u32 %v386_v7, 7  ;;  %s1759_s6 = sshll.u32 %s1929_s29, 4  ;;  %s1760_s6 = int_to_ptr.vmem [resolvable:$false] %s1759_s6 }
  0xca   : > { %1314 = vmatprep.subr.bf16.mxu0 %v1581_v2  ;;  %1388 = vmatprep.subr.bf16.mxu1 %v1582_v3  ;;  %v1587_v9 = vld [vmem:[#allocation10 + $0x58] sm:$0xff]   ;;  %v1588_v10 = vld [vmem:[#allocation10 + $0x90] sm:$0xff]   ;;  %v1590_v13 = vld [vmem:[#allocation10 + $0x60] sm:$0xff]   ;;  %s1761_s12 = scalar_lea.vmem %s1760_s6, 256 }
  0xcb   : > { %1389 = vmatpush3.bf16.msra.mxu1 %v1582_v3  ;;  %v1589_v11 = vld [vmem:[#allocation10 + $0x18] sm:$0xff]   ;;  %v1592_v15 = vld [vmem:[#allocation10 + $0x20] sm:$0xff]   ;;  %v388_v16 = vadd.s32 8, %v2347_v12  ;;  %v389_v19 = vadd.s32 16, %v2347_v12  ;;  %v1593_v20 = vld [vmem:[#allocation10 + $0x68] sm:$0xff]   ;;  %vm427_vm12 = vcmp.lt.s32.totalorder %v2347_v12, 1 }
  0xcc   : > { %1390 = vmatprep.subr.bf16.mxu1 %v1585_v6  ;;  %v1591_v14 = vld [vmem:[#allocation10 + $0x98] sm:$0xff]   ;;  %v1594_v18 = vld [vmem:[#allocation10 + $0xa0] sm:$0xff]   ;;  %v1595_v22 = vld [vmem:[#allocation10 + $0x28] sm:$0xff]   ;;  %vm438_vm13 = vcmp.lt.s32.totalorder %v2347_v12, 7 }
  0xcd   : > { %1315 = vmatpush3.bf16.msra.mxu0 %v1583_v4  ;;  %s1251_s20 = sshll.u32 %s2581_s23, 3  ;;  %s382_s24 = sld [smem:[#allocation3 + %s2582_s26]]  ;;  %v1597_v25 = vld [vmem:[#allocation10 + $0xa8] sm:$0xff]   ;;  %v1596_v27 = vld [vmem:[#allocation10 + $0x70] sm:$0xff]   ;;  %v1599_v33 = vld [vmem:[#allocation10 + $0x78] sm:$0xff]  }
  0xce   : > { %1316 = vmatprep.subr.bf16.mxu0 %v1584_v5  ;;  %s1252_s28 = sadd.s32 4294967288, %s1251_s20  ;;  %v1598_v28 = vld [vmem:[#allocation10 + $0x30] sm:$0xff]   ;;  %v2358_v31 = vld [vmem:[%s325_s10] sm:$0xff]  ;;  %v1601_v35 = vld [vmem:[#allocation10 + $0x38] sm:$0xff]   ;;  %s1308_s21 = sshll.u32 %s2582_s26, 1 }
  0xcf   : > { %1391 = vmatpush3.bf16.msra.mxu1 %v1585_v6  ;;  %v392_v17 = vstv %s1252_s28  ;;  %v1600_v29 = vld [vmem:[#allocation10 + $0xb0] sm:$0xff]   ;;  %vm413_vm8 = vcmp.gt.f32.partialorder %v2358_v31, 0.0  ;;  %v416_v38 = vmul.f32 0.1, %v2358_v31  ;;  %v1602_v46 = vld [vmem:[#allocation10 + $0xb8] sm:$0xff]   ;;  %v1603_v51 = vld [vmem:[#allocation10 + $0x100] sm:$0xff]   ;;  %s1082_s10 = sadd.s32 %s2581_s23, %s1308_s21 }
  0xd0   : > { %1392 = vmatprep.subr.bf16.mxu1 %v1588_v10  ;;  %v393_v21 = vadd.s32 %v392_v17, %v2347_v12  ;;  %v394_v23 = vadd.s32 %v392_v17, %v388_v16  ;;  %v395_v26 = vadd.s32 %v392_v17, %v389_v19  ;;  %v2354_v30 = vld [vmem:[%s316_s30] sm:$0xff]  ;;  %v1604_v57 = vld [vmem:[#allocation10 + $0xc0] sm:$0xff]   ;;  %v1606_v6 = vld [vmem:[#allocation10 + $0x108] sm:$0xff]   ;;  %s2583_s30 = sld [smem:[#allocation29_spill]]  ;;  %s1309_s4 = sshll.u32 %s1082_s10, 7 }
  0xd1   : > { %1317 = vmatpush3.bf16.msra.mxu0 %v1586_v8  ;;  %v2362_v32 = vld [vmem:[%s334_s22] sm:$0xff]  ;;  %vm412_vm7 = vcmp.gt.f32.partialorder %v2354_v30, 0.0  ;;  %v415_v34 = vmul.f32 0.1, %v2354_v30  ;;  %v419_v43 = vsel %vm413_vm8, %v2358_v31, %v416_v38  ;;  %v1605_v58 = vld [vmem:[#allocation10 + $0x140] sm:$0xff]   ;;  %v1607_v7 = vld [vmem:[#allocation10 + $0xc8] sm:$0xff]  }
  0xd2   : > { %1318 = vmatprep.subr.bf16.mxu0 %v1587_v9  ;;  %vm396_vm0 = vcmp.ge.s32.totalorder %v393_v21, 0  ;;  %vm397_vm2 = vcmp.ge.s32.totalorder %v394_v23, 0  ;;  %vm398_vm4 = vcmp.ge.s32.totalorder %v395_v26, 0  ;;  %vm414_vm9 = vcmp.gt.f32.partialorder %v2362_v32, 0.0  ;;  %v1608_v8 = vld [vmem:[#allocation10 + $0x148] sm:$0xff]   ;;  %v1609_v9 = vld [vmem:[#allocation10 + $0x110] sm:$0xff]  }
  0xd3   : > { %1393 = vmatpush3.bf16.msra.mxu1 %v1588_v10  ;;  %v399_v24 = vstv %s382_s24  ;;  %v417_v39 = vmul.f32 0.1, %v2362_v32  ;;  %v418_v41 = vsel %vm412_vm7, %v2354_v30, %v415_v34  ;;  %v1610_v10 = vld [vmem:[#allocation10 + $0xd0] sm:$0xff]   ;;  %v1615_v16 = vld [vmem:[#allocation10 + $0x120] sm:$0xff]   ;;  %v1618_v19 = vld [vmem:[#allocation10 + $0x128] sm:$0xff]   ;;  %s374_s22 = scalar_lea.vmem [#allocation12], %s2326_s7 }
  0xd4   : > { %1394 = vmatprep.subr.bf16.mxu1 %v1591_v14  ;;  %vm400_vm1 = vcmp.lt.s32.totalorder %v393_v21, %v399_v24  ;;  %vm401_vm3 = vcmp.lt.s32.totalorder %v394_v23, %v399_v24  ;;  %vm402_vm5 = vcmp.lt.s32.totalorder %v395_v26, %v399_v24  ;;  %v1616_v17 = vld [vmem:[#allocation10 + $0xe0] sm:$0xff]   ;;  %v1620_v21 = vld [vmem:[#allocation10 + $0x168] sm:$0xff]   ;;  %v1622_v23 = vld [vmem:[#allocation10 + $0xf0] sm:$0xff]   ;;  %s1086_s20 = sshll.u32 %s374_s22, 4  ;;  %s2585_s26 = sld [smem:[#allocation30_spill]]  ;;  %s2434_s20 = int_to_ptr.vmem [resolvable:$true] %s1086_s20 }
  0xd5   : > { %1319 = vmatpush3.bf16.msra.mxu0 %v1589_v11  ;;  %vm403_vm6 = vmand %vm396_vm0, %vm400_vm1  ;;  %v420_v44 = vsel %vm414_vm9, %v2362_v32, %v417_v39  ;;  %v1611_v11 = vld [vmem:[#allocation10 + $0x150] sm:$0xff]   ;;  %v1625_v26 = vld [vmem:[#allocation10 + $0xf8] sm:$0xff]   ;;  %vm757_vm1 = vcmp.lt.s32.totalorder %v2347_v12, 3  ;;  %s1071_s23 = scalar_lea.sflag [#allocation6], %s323_s25  ;;  %s1755_s7 = scalar_lea.vmem %s2434_s20, 128 }
  0xd6   : > { %1320 = vmatprep.subr.bf16.mxu0 %v1590_v13  ;;  %vm404_vm10 = vmand %vm397_vm2, %vm401_vm3  ;;  %v2371_v37 = vsel %vm403_vm6, 1.0, %v1928_v36  ;;  %v1612_v13 = vld [vmem:[#allocation10 + $0x118] sm:$0xff]   ;;  %v1623_v24 = vld [vmem:[#allocation10 + $0x170] sm:$0xff]   ;;  %vm768_vm2 = vcmp.lt.s32.totalorder %v2347_v12, 5  ;;  %p1756_p2 = scmp.ne.s32.totalorder %s2434_s20, %s1755_s7  ;;  %p2586_p6 = scmp.ne.s32.totalorder %s2584_s16, 0 }
  0xd7   : > { %1395 = vmatpush3.bf16.msra.mxu1 %v1591_v14  ;;  %vm405_vm11 = vmand %vm398_vm4, %vm402_vm5  ;;  %v2377_v40 = vsel %vm404_vm10, 1.0, %v1928_v36  ;;  %v421_v45 = vmul.f32 %v2371_v37, %v418_v41  ;;  %v1613_v14 = vld [vmem:[#allocation10 + $0xd8] sm:$0xff]   ;;  %p1762_p13 = scmp.lt.s32.totalorder %s2434_s20, %s1760_s6  ;;  %p1763_p10 = scmp.lt.s32.totalorder %s1761_s12, %s1755_s7 }
  0xd8   : > { %1396 = vmatprep.subr.bf16.mxu1 %v1594_v18  ;;  %v2381_v42 = vsel %vm405_vm11, 1.0, %v1928_v36  ;;  %v422_v47 = vmul.f32 %v2377_v40, %v419_v43  ;;  %p1757_p0 = pnand %p1756_p2, %p2586_p6 }
  0xd9   : > { %1321 = vmatpush3.bf16.msra.mxu0 %v1592_v15  ;;  %v423_v48 = vmul.f32 %v2381_v42, %v420_v44  ;;  %v424_v49 = vrot.slane %v421_v45, 7  ;;  %v435_v50 = vrot.slane %v421_v45, 1  ;;  %v1614_v15 = vld [vmem:[#allocation10 + $0x158] sm:$0xff]   ;;  %p1764_p7 = por %p1763_p10, %p1762_p13 }
  0xda   : > { %1322 = vmatprep.subr.bf16.mxu0 %v1593_v20  ;;  %v425_v52 = vrot.slane %v422_v47, 7  ;;  %v433_v53 = vpack.c.bf16 %v422_v47, %v421_v45  ;;  %v436_v55 = vrot.slane %v422_v47, 1  ;;  %v1619_v20 = vld [vmem:[#allocation10 + $0xe8] sm:$0xff]   ;;  %s2432_s2 = scalar_lea.hbm %s2585_s26, %s1309_s4  ;;  %p1758_p4 = pneg %p1757_p0 }
  0xdb   : > { %1397 = vmatpush3.bf16.msra.mxu1 %v1594_v18  ;;  %v426_v54 = vrot.slane %v423_v48, 7  ;;  %v437_v56 = vrot.slane %v423_v48, 1  ;;  %v434_v62 = vpack.c.bf16 %v423_v48, %v423_v48  ;;  %v1617_v18 = vld [vmem:[#allocation10 + $0x160] sm:$0xff]  }
  0xdc   : > { %1398 = vmatprep.subr.bf16.mxu1 %v1597_v25  ;;  %675 = vmatprep.mubr.bf16.mxu0 %v433_v53  ;;  %v429_v59 = vsel %vm427_vm12, %v424_v49, %v425_v52  ;;  %v440_v61 = vsel %vm438_vm13, %v435_v50, %v436_v55  ;;  %p1765_p12 = pnand %p1764_p7, %p1758_p4 }
  0xdd   : > { %1323 = vmatpush3.bf16.msra.mxu0 %v1595_v22  ;;  %v430_v60 = vsel %vm427_vm12, %v426_v54, %v424_v49  ;;  %v439_v0 = vsel %vm438_vm13, %v436_v55, %v437_v56  ;;  %v441_v1 = vsel %vm438_vm13, %v437_v56, %v435_v50  ;;  %v428_v4 = vsel %vm427_vm12, %v425_v52, %v426_v54  ;;  %v1621_v22 = vld [vmem:[#allocation10 + $0x130] sm:$0xff]  }
  0xde   : > { %1324 = vmatprep.subr.bf16.mxu0 %v1596_v27  ;;  %v431_v63 = vpack.c.bf16 %v429_v59, %v430_v60  ;;  %v442_v2 = vpack.c.bf16 %v439_v0, %v440_v61  ;;  %v443_v3 = vpack.c.bf16 %v441_v1, %v441_v1  ;;  %v432_v5 = vpack.c.bf16 %v428_v4, %v428_v4  ;;  %v1626_v27 = vld [vmem:[#allocation10 + $0x178] sm:$0xff]  }
  0xdf   : > { %1399 = vmatpush3.bf16.msra.mxu1 %v1597_v25  ;;  %v1624_v25 = vld [vmem:[#allocation10 + $0x138] sm:$0xff]  }
  0xe0   : > { %1400 = vmatprep.subr.bf16.mxu1 %v1600_v29  ;;  %1404 = vmatprep.mubr.bf16.mxu1 %v442_v2 }
  0xe1   : > { %1325 = vmatpush3.bf16.msra.mxu0 %v1598_v28 }
  0xe2   : > { %1326 = vmatprep.subr.bf16.mxu0 %v1599_v33  ;;  %v1256_v33 = vld [vmem:[%s2583_s30] ss:$0 sm:$0xff] }
  0xe3   : > { %1401 = vmatpush3.bf16.msra.mxu1 %v1600_v29 }
  0xe4   : > { %1402 = vmatprep.subr.bf16.mxu1 %v1602_v46 }
  0xe5   : > { %1327 = vmatpush3.bf16.msra.mxu0 %v1601_v35 }
  0xe6   : > { %1350 = vmatprep.subr.bf16.mxu0 %v1603_v51 }
  0xe7   : > { %1403 = vmatpush3.bf16.msra.mxu1 %v1602_v46 }
  0xe8   : > { %676 = vmatmul.mubr.bf16.vlgmr.msra.gmra.mrb[0].mxu0 %v431_v63  ;;  %1408 = vmatprep.subr.bf16.mxu1 %v1605_v58 }
  0xe9   : > { %683 = vmatprep.mubr.bf16.mxu0 %v434_v62  ;;  %1351 = vmatpush3.bf16.msra.mxu0 %v1604_v57 }
  0xea   : > { %1405 = vmatmul.mubr.bf16.vlgmr.msra.gmra.mrb[0].mxu1 %v443_v3  ;;  %1352 = vmatprep.subr.bf16.mxu0 %v1606_v6 }
  0xeb   : > { %1409 = vmatpush3.bf16.msra.mxu1 %v1605_v58 }
  0xec   : > { %1410 = vmatprep.subr.bf16.mxu1 %v1608_v8 }
  0xed   : > { %1353 = vmatpush3.bf16.msra.mxu0 %v1607_v7 }
  0xee   : > { %1354 = vmatprep.subr.bf16.mxu0 %v1609_v9 }
  0xef   : > { %1411 = vmatpush3.bf16.msra.mxu1 %v1608_v8 }
  0xf0   : > { %684 = vmatmul.mubr.bf16.gmra.mrb[4].mxu0 %v432_v5  ;;  %1412 = vmatprep.subr.bf16.mxu1 %v1611_v11 }
  0xf1   : > { %1355 = vmatpush3.bf16.msra.mxu0 %v1610_v10 }
  0xf2   : > { %1356 = vmatprep.subr.bf16.mxu0 %v1612_v13 }
  0xf3   : > { %1413 = vmatpush3.bf16.msra.mxu1 %v1611_v11 }
  0xf4   : > { %1414 = vmatprep.subr.bf16.mxu1 %v1614_v15 }
  0xf5   : > { %1357 = vmatpush3.bf16.msra.mxu0 %v1613_v14 }
  0xf6   : > { %1358 = vmatprep.subr.bf16.mxu0 %v1615_v16 }
  0xf7   : > { %1415 = vmatpush3.bf16.msra.mxu1 %v1614_v15 }
  0xf8   : > { %1416 = vmatprep.subr.bf16.mxu1 %v1617_v18 }
  0xf9   : > { %1359 = vmatpush3.bf16.msra.mxu0 %v1616_v17 }
  0xfa   : > { %1360 = vmatprep.subr.bf16.mxu0 %v1618_v19 }
  0xfb   : > { %1417 = vmatpush3.bf16.msra.mxu1 %v1617_v18 }
  0xfc   : > { %1418 = vmatprep.subr.bf16.mxu1 %v1620_v21 }
  0xfd   : > { %1361 = vmatpush3.bf16.msra.mxu0 %v1619_v20 }
  0xfe   : > { %1362 = vmatprep.subr.bf16.mxu0 %v1621_v22 }
  0xff   : > { %1419 = vmatpush3.bf16.msra.mxu1 %v1620_v21 }
 0x100   : > { %1420 = vmatprep.subr.bf16.mxu1 %v1623_v24 }
 0x101   : > { %1363 = vmatpush3.bf16.msra.mxu0 %v1622_v23 }
 0x102   : > { %1364 = vmatprep.subr.bf16.mxu0 %v1624_v25  ;;  %v1282_v25 = vld [vmem:[%s2583_s30 + $0x1] ss:$0 sm:$0xff] }
 0x103   : > { %1421 = vmatpush3.bf16.msra.mxu1 %v1623_v24 }
 0x104   : > { %1422 = vmatprep.subr.bf16.mxu1 %v1626_v27 }
 0x105   : > { %1365 = vmatpush3.bf16.msra.mxu0 %v1625_v26 }
 0x107   : > { %1423 = vmatpush3.bf16.msra.mxu1 %v1626_v27 }
 0x1bb   : > { %v1328_v28 = vpop.f32.mrb[0].mxu0 }
 0x1bc   : > { %v1329_v29 = vpop.f32.mrb[1].mxu0 }
 0x1bd   : > { %v1330_v34 = vadd.f32 %v1329_v29, %v1328_v28  ;;  %v1331_v35 = vpop.f32.mrb[2].mxu0  ;;  %v1406_v36 = vpop.f32.mrb[0].mxu1 }
 0x1be   : > { %v1332_v38 = vpop.f32.mrb[3].mxu0  ;;  %v725_v39 = vpop.f32.mrb[1].mxu1 }
 0x1bf   : > { %v1333_v41 = vadd.f32 %v1332_v38, %v1331_v35  ;;  %v678_v43 = vadd.f32 %v1330_v34, %v1256_v33  ;;  %v1407_v44 = vpop.f32.mrb[2].mxu1 }
 0x1c0   : > { %v728_v45 = vpop.f32.mrb[3].mxu1 }
 0x1c1   : > { %v726_v46 = vadd.f32 %v725_v39, %v678_v43  ;;  %v681_v47 = vadd.f32 %v1333_v41, %v1256_v33 }
 0x1c3   : > { %v739_v48 = vadd.f32 %v726_v46, %v2354_v30  ;;  %v729_v49 = vadd.f32 %v728_v45, %v681_v47  ;;  %v1334_v50 = vpop.f32.mrb[4].mxu0 }
 0x1c4   : > { %v1335_v51 = vpop.f32.mrb[5].mxu0 }
 0x1c5   : > { %vm742_vm14 = vcmp.gt.f32.partialorder %v739_v48, 0.0  ;;  %v745_v52 = vmul.f32 0.1, %v739_v48  ;;  %v740_v53 = vadd.f32 %v729_v49, %v2358_v31  ;;  %v1336_v54 = vadd.f32 %v1335_v51, %v1334_v50  ;;  %v1337_v55 = vpop.f32.mrb[6].mxu0 }
 0x1c6   : > { %v1338_v56 = vpop.f32.mrb[7].mxu0 }
 0x1c7   : > { %v748_v57 = vsel %vm742_vm14, %v739_v48, %v745_v52  ;;  %vm743_vm15 = vcmp.gt.f32.partialorder %v740_v53, 0.0  ;;  %v746_v58 = vmul.f32 0.1, %v740_v53  ;;  %v686_v59 = vadd.f32 %v1336_v54, %v1256_v33 }
 0x1c8   : > { %v751_v62 = vmul.f32 %v2371_v37, %v748_v57 }
 0x1c9   : > { %v734_v60 = vadd.f32 %v1406_v36, %v686_v59  ;;  %v749_v61 = vsel %vm743_vm15, %v740_v53, %v746_v58 }
 0x1ca   : > { %v752_v30 = vmul.f32 %v2377_v40, %v749_v61  ;;  %v754_v5 = vrot.slane %v751_v62, 5  ;;  %v765_v37 = vrot.slane %v751_v62, 3 }
 0x1cb   : > { %v741_v63 = vadd.f32 %v734_v60, %v2362_v32 }
 0x1cc   : > { %v763_v0 = vpack.c.bf16 %v752_v30, %v751_v62  ;;  %v755_v2 = vrot.slane %v752_v30, 5  ;;  %v766_v4 = vrot.slane %v752_v30, 3 }
 0x1cd   : > { %vm744_vm0 = vcmp.gt.f32.partialorder %v741_v63, 0.0  ;;  %v747_v1 = vmul.f32 0.1, %v741_v63 }
 0x1ce   : > { %1007 = vmatprep.mubr.bf16.mxu0 %v763_v0  ;;  %v759_v32 = vsel %vm757_vm1, %v754_v5, %v755_v2  ;;  %v770_v10 = vsel %vm768_vm2, %v765_v37, %v766_v4 }
 0x1cf   : > { %v750_v31 = vsel %vm744_vm0, %v741_v63, %v747_v1 }
 0x1d0   : > { %v753_v3 = vmul.f32 %v2381_v42, %v750_v31 }
 0x1d2   : > { %v756_v6 = vrot.slane %v753_v3, 5  ;;  %v767_v7 = vrot.slane %v753_v3, 3  ;;  %v764_v15 = vpack.c.bf16 %v753_v3, %v753_v3 }
 0x1d4   : > { %v760_v8 = vsel %vm757_vm1, %v756_v6, %v754_v5  ;;  %v769_v9 = vsel %vm768_vm2, %v766_v4, %v767_v7  ;;  %v771_v11 = vsel %vm768_vm2, %v767_v7, %v765_v37  ;;  %v758_v16 = vsel %vm757_vm1, %v755_v2, %v756_v6 }
 0x1d5   : > { %v761_v13 = vpack.c.bf16 %v759_v32, %v760_v8  ;;  %v772_v42 = vpack.c.bf16 %v769_v9, %v770_v10  ;;  %v773_v14 = vpack.c.bf16 %v771_v11, %v771_v11  ;;  %v762_v17 = vpack.c.bf16 %v758_v16, %v758_v16 }
 0x1d7   : > { %1008 = vmatmul.mubr.bf16.vlgmr.msra.gmra.mrb[8].mxu0 %v761_v13  ;;  %1424 = vmatprep.mubr.bf16.mxu1 %v772_v42 }
 0x1d8   : > { %1014 = vmatprep.mubr.bf16.mxu0 %v764_v15  ;;  %1425 = vmatmul.mubr.bf16.vlgmr.msra.gmra.mrb[4].mxu1 %v773_v14 }
 0x1df   : > { %1015 = vmatmul.mubr.bf16.gmra.mrb[12].mxu0 %v762_v17 }
 0x2aa   : > { %v1366_v18 = vpop.f32.mrb[8].mxu0 }
 0x2ab   : > { %v1367_v19 = vpop.f32.mrb[9].mxu0  ;;  %v1426_v20 = vpop.f32.mrb[4].mxu1 }
 0x2ac   : > { %v1369_v21 = vpop.f32.mrb[10].mxu0  ;;  %v1055_v22 = vpop.f32.mrb[5].mxu1 }
 0x2ad   : > { %v1370_v23 = vpop.f32.mrb[11].mxu0  ;;  %v1427_v24 = vpop.f32.mrb[6].mxu1 }
 0x2ae   : > { %v1371_v26 = vadd.f32 %v1370_v23, %v1369_v21  ;;  %v1057_v27 = vpop.f32.mrb[7].mxu1 }
 0x2b0   : > { %v1012_v12 = vadd.f32 %v1371_v26, %v1282_v25 }
 0x2b2   : > { %v1058_v28 = vadd.f32 %v1057_v27, %v1012_v12  ;;  %v1372_v29 = vpop.f32.mrb[12].mxu0 }
 0x2b3   : > { %v1373_v33 = vpop.f32.mrb[13].mxu0 }
 0x2b4   : > { %v1067_v34 = vadd.f32 %v1058_v28, %v740_v53  ;;  %v1375_v35 = vpop.f32.mrb[14].mxu0 }
 0x2b5   : > { %v1376_v36 = vpop.f32.mrb[15].mxu0 }
 0x2b6   : > { %v1068_v38 = vmul.f32 %v2377_v40, %v1067_v34 }
 0x2b8   : > { %1069 = vst [vmem:[%s374_s22] sm:$0xff] %v1068_v38 }
 0x2b9   : > { %1768 = shalt.err (!%p1765_p12)
}
 0x2ba   : > { %s1769_s25 = scalar_lea.hbm %s2432_s2, 128  ;;  %s1773_s4 = scalar_lea.hbm %s2585_s26, 512 }
 0x2bb   : > { %p1770_p11 = scmp.ne.s32.totalorder %s2432_s2, %s1769_s25  ;;  %p1774_p8 = scmp.lt.u32.totalorder %s2432_s2, %s2585_s26 }
 0x2bc   : > { %p1775_p5 = scmp.lt.u32.totalorder %s1773_s4, %s1769_s25  ;;  %p1777_p2 = scmp.lt.u32.totalorder %s1769_s25, %s2432_s2 }
 0x2bd   : > { %p1771_p1 = pnand %p1770_p11, %p2586_p6 }
 0x2be   : > { %p1776_p3 = por %p1775_p5, %p1774_p8 }
 0x2bf   : > { %p1772_p9 = pneg %p1771_p1 }
 0x2c0   : > { %p1778_p0 = por %p1777_p2, %p1776_p3 }
 0x2c2   : > { %p1779_p4 = pnand %p1778_p0, %p1772_p9 }
 0x2c4   : > { %1782 = shalt.err (!%p1779_p4)
}
 0x2c5   : > { %1438 = dma.vmem_to_hbm [thread:$0]  (%p2586_p6), %s2434_s20, 128, %s2432_s2, %s1071_s23  }
 0x2c6 PF: > { %s2587_s28 = sld [smem:[#allocation19_spill]]  ;;  %s2588_s7 = sld [smem:[#allocation25_spill]] }
 0x2c7   : > { %p1461_p13 = scmp.ge.s32.totalorder %s1919_s19, 2 }
 0x2cc   : > { %s1098_s29 = sand.u32 1, %s2587_s28   ;;  %p2589_p10 = scmp.ne.s32.totalorder %s2588_s7, 0 }
 0x2cd   : > { %s1099_s6 = scalar_lea.sflag [#allocation6], %s1098_s29 }
 0x2ce   : > { %p1455_p7 = pnand %p1461_p13, %p2589_p10 }
 0x2d0   : > { %1858 = dma.done.wait (!%p1455_p7), %s1099_s6, 128  }
 0x2d1   : > { %1860 = vsyncadd (!%p1455_p7), %s1099_s6, 4294967168  ;;  %s30_s19 = sadd.s32 1, %s1919_s19   ;;  %s2591_s20 = sld [smem:[#allocation22_spill]] }
 0x2d2   : > { %p2464_p12 = scmp.ge.s32.totalorder %s30_s19, 6   ;;  %s2592_s2 = sld [smem:[#allocation26_spill]] }
 0x2d3   : > { %s2594_s7 = smov %s1871_s8  ;;  %s2595_s8 = smov %s1875_s9 }
 0x2d4   : > { %s2596_s9 = smov %s2271_s15  ;;  %s2597_s10 = smov %s1883_s11 }
 0x2d5   : > { %s2598_s11 = smov %s1887_s0  ;;  %s2599_s0 = smov %s2207_s27 }
 0x2d6   : > { %s2600_s12 = smov %s1895_s13  ;;  %s2601_s13 = smov %s1899_s14 }
 0x2d7   : > { %s2602_s14 = smov %s2202_s5  ;;  %s2603_s15 = smov %s1911_s17 }
 0x2d8   : > { %s2604_s16 = smov %s1915_s18  ;;  %s2605_s17 = smov %s2591_s20 }
 0x2d9   : > { %s2606_s18 = smov %s2592_s2  ;;  %29 = sbr.rel (!%p2464_p12) target bundleno = 26 (0x1a), region = 115 }
 0x2e0   :  { %1104 = vsyncpa [#allocation5], 1 }
 0x2e1   :  { %1106 = vsyncpa [#allocation5 + $0x1], 1 }
 0x2e2   :  { %1107 = vsyncpa [#allocation8], 1 }
 0x2e3   :  { %1109 = vsyncpa [#allocation8 + $0x1], 1 }
 0x2e4   :  { %1110 = vsyncpa [#allocation11], 1 }
 0x2e5   :  { %1111 = vsyncpa [#allocation6], 1 }
 0x2e6   :  { %1113 = vsyncpa [#allocation6 + $0x1], 1 }

</bundles_post_ra>
